<compile_context>
chip_gen: v5e
topology: v5e:2x2
jax: 0.10.0
libtpu: 0.0.40
codegen_flags: <defaults>
</compile_context>

<pallas_src>
import functools

import jax
import jax.numpy as jnp
from jax.experimental import pallas as pl
from jax.experimental.pallas import tpu as pltpu


def _round_up(x, m):
    return pl.cdiv(x, m) * m


def _channel_attn_kernel(inv_ref, pts_ref, w1_ref, b1_ref, w2_ref, b2_ref,
                         out_ref, sum_acc, max_acc, *, tu, c_in):
    n_idx = pl.program_id(1)

    @pl.when(n_idx == 0)
    def _init():
        sum_acc[...] = jnp.zeros_like(sum_acc)
        max_acc[...] = jnp.full_like(max_acc, -jnp.inf)

    inv = inv_ref[...]            # [1, TN] int32, points lane-dense (pad rows = -1)
    pts_t = pts_ref[...]          # [Cin+1, TN] f32, last row = ones (for counts)
    tn = pts_t.shape[1]

    u_base = pl.program_id(0) * tu
    pillar_ids = jax.lax.broadcasted_iota(jnp.int32, (tu, tn), 0) + u_base
    onehot = pillar_ids == inv    # [TU, TN] bool; sentinel -1 never matches

    # ---- segment sum + point count in ONE MXU matmul (f32 operands, exact) ----
    onehot_f = onehot.astype(jnp.float32)
    sum_acc[...] += jax.lax.dot_general(
        onehot_f, pts_t,
        dimension_numbers=(((1,), (1,)), ((), ())),         # onehot @ pts_t^T
        preferred_element_type=jnp.float32)                  # [TU, Cin+1]

    # ---- segment max: channel-chunked masked running max (few live vregs) ----
    neg_inf = jnp.float32(-jnp.inf)
    cols = []
    for c in range(c_in):                                     # static unroll over Cin
        masked = jnp.where(onehot, pts_t[c:c + 1, :], neg_inf)   # [TU, TN] transient
        cols.append(jnp.max(masked, axis=1, keepdims=True))      # [TU, 1]
    tile_max = jnp.concatenate(cols, axis=1)                     # [TU, Cin]
    max_acc[...] = jnp.maximum(max_acc[...], tile_max)

    # ---- finalize: fused per-pillar MLP head + sigmoid, once per pillar tile --
    @pl.when(n_idx == pl.num_programs(1) - 1)
    def _finalize():
        sums = sum_acc[...]
        cnt = sums[:, c_in:c_in + 1]                          # [TU, 1] point counts
        has_pts = cnt > 0.0                                   # guards padded pillars
        mean_feat = sums[:, :c_in] / jnp.maximum(cnt, 1.0)
        max_feat = jnp.where(has_pts, max_acc[...], 0.0)

        # single fc1 -> relu -> fc2 pass over [max_feat; mean_feat]
        x = jnp.concatenate([max_feat, mean_feat], axis=0)    # [2*TU, Cin]
        h = jnp.dot(x, w1_ref[...], preferred_element_type=jnp.float32) + b1_ref[...]
        h = jnp.maximum(h, 0.0)                                # ReLU
        y = jnp.dot(h, w2_ref[...], preferred_element_type=jnp.float32) + b2_ref[...]
        logits = y[:tu, :] + y[tu:, :]
        out_ref[...] = 1.0 / (1.0 + jnp.exp(-logits))          # sigmoid


def _vmem_limit_bytes():
    # Budget against the actual generation (v7x only has 64 MiB physical VMEM).
    try:
        cap = pltpu.get_tpu_info().vmem_capacity_bytes
    except Exception:
        cap = 64 * 1024 * 1024
    return min(cap // 2, 64 * 1024 * 1024)


def channel_attn2(points, unq_inv, params, num_pillars, *, tn=512, tu=128):
    """ChannelAttn2 forward. Returns [num_pillars, out_channel] float32."""
    n, c_in = points.shape
    c_out = params["w2"].shape[1]

    # Adaptive tiles: small problems collapse to a single grid step; large ones
    # keep TU=128 / TN=512 (MXU fill + per-step-overhead amortization).
    tn_eff = min(tn, _round_up(n, 128))
    tu_eff = min(tu, _round_up(num_pillars, 8))
    n_pad = _round_up(n, tn_eff)
    u_pad = _round_up(num_pillars, tu_eff)

    # Transposed, lane-dense point block with a trailing ones row (-> counts).
    pts_t = jnp.zeros((c_in + 1, n_pad), jnp.float32)
    pts_t = pts_t.at[:c_in, :n].set(points.astype(jnp.float32).T)
    pts_t = pts_t.at[c_in, :n].set(1.0)

    # Padded point rows carry sentinel -1 so they never contribute to any pillar.
    inv = jnp.full((1, n_pad), -1, jnp.int32).at[0, :n].set(unq_inv.astype(jnp.int32))

    grid = (u_pad // tu_eff, n_pad // tn_eff)
    kernel = functools.partial(_channel_attn_kernel, tu=tu_eff, c_in=c_in)

    out = pl.pallas_call(
        kernel,
        out_shape=jax.ShapeDtypeStruct((u_pad, c_out), jnp.float32),
        grid_spec=pltpu.PrefetchScalarGridSpec(
            num_scalar_prefetch=0,
            grid=grid,
            in_specs=[
                pl.BlockSpec((1, tn_eff), lambda u, k: (0, k)),           # unq_inv [1, N]
                pl.BlockSpec((c_in + 1, tn_eff), lambda u, k: (0, k)),    # points^T [Cin+1, N]
                pl.BlockSpec(params["w1"].shape, lambda u, k: (0, 0)),    # fc1 weight
                pl.BlockSpec(params["b1"].shape, lambda u, k: (0, 0)),    # fc1 bias
                pl.BlockSpec(params["w2"].shape, lambda u, k: (0, 0)),    # fc2 weight
                pl.BlockSpec(params["b2"].shape, lambda u, k: (0, 0)),    # fc2 bias
            ],
            out_specs=pl.BlockSpec((tu_eff, c_out), lambda u, k: (u, 0)),
            scratch_shapes=[
                pltpu.VMEM((tu_eff, c_in + 1), jnp.float32),  # sum + count accumulator
                pltpu.VMEM((tu_eff, c_in), jnp.float32),      # max accumulator
            ],
        ),
        compiler_params=pltpu.CompilerParams(
            dimension_semantics=("parallel", "arbitrary"),    # pillar tiles shard across TCs
            vmem_limit_bytes=_vmem_limit_bytes(),
        ),
    )(inv, pts_t, params["w1"], params["b1"], params["w2"], params["b2"])

    return out[:num_pillars]


def init_params(key, in_channel, out_channel):
    hidden = in_channel * 2
    k1, k2, k3, k4 = jax.random.split(key, 4)

    def linear(kw, kb, fan_in, fan_out):
        bound = 1.0 / jnp.sqrt(jnp.asarray(fan_in, jnp.float32))
        # torch Linear weight is [out, in]; store transposed [in, out] for x @ W
        w = jax.random.uniform(kw, (fan_in, fan_out), jnp.float32, -bound, bound)
        b = jax.random.uniform(kb, (1, fan_out), jnp.float32, -bound, bound)
        return w, b

    w1, b1 = linear(k1, k2, in_channel, hidden)
    w2, b2 = linear(k3, k4, hidden, out_channel)
    return dict(w1=w1, b1=b1, w2=w2, b2=b2)


def reference(points, unq_inv, params, num_pillars):
    max_feat = jax.ops.segment_max(points, unq_inv, num_segments=num_pillars)
    sums = jax.ops.segment_sum(points, unq_inv, num_segments=num_pillars)
    cnt = jax.ops.segment_sum(jnp.ones((points.shape[0], 1), points.dtype),
                              unq_inv, num_segments=num_pillars)
    mean_feat = sums / jnp.maximum(cnt, 1.0)

    def mlp(x):
        h = jnp.maximum(x @ params["w1"] + params["b1"], 0.0)
        return h @ params["w2"] + params["b2"]

    return jax.nn.sigmoid(mlp(max_feat) + mlp(mean_feat))


if __name__ == "__main__":
    N, C_IN, C_OUT, U = 200, 16, 32, 56   # N, U deliberately not tile multiples

    key = jax.random.PRNGKey(0)
    k_pts, k_perm, k_params = jax.random.split(key, 3)

    points = jax.random.normal(k_pts, (N, C_IN), jnp.float32)
    # unq_inv comes from torch.unique inverse -> every pillar id appears at least once
    unq_inv = jax.random.permutation(k_perm, jnp.arange(N, dtype=jnp.int32) % U)
    params = init_params(k_params, C_IN, C_OUT)

    out = channel_attn2(points, unq_inv, params, U)
    out = jax.block_until_ready(out)

    ref = reference(points, unq_inv, params, U)
    assert out.shape == (U, C_OUT)
    assert jnp.allclose(out, ref, atol=5e-3, rtol=5e-3), "mismatch vs pure-JAX reference"

    print("KERNEL_OK")
</pallas_src>

<mosaic_0001>
module attributes {stable_mosaic.version = 11 : i64} {
  func.func @_channel_attn_kernel(%arg0: i32, %arg1: i32, %arg2: memref<1x256xi32, #tpu.memory_space<vmem>>, %arg3: memref<17x256xf32, #tpu.memory_space<vmem>>, %arg4: memref<16x32xf32, #tpu.memory_space<vmem>>, %arg5: memref<1x32xf32, #tpu.memory_space<vmem>>, %arg6: memref<32x32xf32, #tpu.memory_space<vmem>>, %arg7: memref<1x32xf32, #tpu.memory_space<vmem>>, %arg8: memref<56x32xf32, #tpu.memory_space<vmem>>, %arg9: memref<56x17xf32, #tpu.memory_space<vmem>>, %arg10: memref<56x16xf32, #tpu.memory_space<vmem>>) attributes {dimension_semantics = [#tpu.dimension_semantics<parallel>, #tpu.dimension_semantics<arbitrary>], iteration_bounds = array<i64: 1, 1>, scalar_prefetch = 0 : i64, scratch_operands = 2 : i64, tpu.core_type = #tpu.core_type<tc>, window_params = [{transform_indices = @transform_0, window_bounds = array<i64: 1, 256>}, {transform_indices = @transform_1, window_bounds = array<i64: 17, 256>}, {pipeline_mode = #tpu.pipeline_mode<synchronous>, transform_indices = @transform_2, window_bounds = array<i64: 16, 32>}, {pipeline_mode = #tpu.pipeline_mode<synchronous>, transform_indices = @transform_3, window_bounds = array<i64: 1, 32>}, {pipeline_mode = #tpu.pipeline_mode<synchronous>, transform_indices = @transform_4, window_bounds = array<i64: 32, 32>}, {pipeline_mode = #tpu.pipeline_mode<synchronous>, transform_indices = @transform_5, window_bounds = array<i64: 1, 32>}, {transform_indices = @transform_6, window_bounds = array<i64: 56, 32>}]} {
    %c0_i32 = arith.constant 0 : i32
    %0 = arith.cmpi eq, %arg1, %c0_i32 : i32
    %1 = arith.extui %0 : i1 to i32
    %c0_i32_0 = arith.constant 0 : i32
    %2 = arith.cmpi ne, %1, %c0_i32_0 : i32
    scf.if %2 {
      %cst_46 = arith.constant 0.000000e+00 : f32
      %136 = vector.broadcast %cst_46 : f32 to vector<56x17xf32>
      %c0_47 = arith.constant 0 : index
      %c0_48 = arith.constant 0 : index
      %137 = vector.load %arg9[%c0_47, %c0_48] : memref<56x17xf32, #tpu.memory_space<vmem>>, vector<56x17xf32>
      tpu.vector_store %arg9[%c0_47, %c0_48], %136 {strides = array<i32>} : memref<56x17xf32, #tpu.memory_space<vmem>>, vector<56x17xf32>,
      %cst_49 = arith.constant 0xFF800000 : f32
      %138 = vector.broadcast %cst_49 : f32 to vector<56x16xf32>
      %c0_50 = arith.constant 0 : index
      %c0_51 = arith.constant 0 : index
      %139 = vector.load %arg10[%c0_50, %c0_51] : memref<56x16xf32, #tpu.memory_space<vmem>>, vector<56x16xf32>
      tpu.vector_store %arg10[%c0_50, %c0_51], %138 {strides = array<i32>} : memref<56x16xf32, #tpu.memory_space<vmem>>, vector<56x16xf32>,
    } else {
    }
    %c0 = arith.constant 0 : index
    %c0_1 = arith.constant 0 : index
    %3 = vector.load %arg2[%c0, %c0_1] : memref<1x256xi32, #tpu.memory_space<vmem>>, vector<1x256xi32>
    %c0_2 = arith.constant 0 : index
    %c0_3 = arith.constant 0 : index
    %4 = vector.load %arg3[%c0_2, %c0_3] : memref<17x256xf32, #tpu.memory_space<vmem>>, vector<17x256xf32>
    %c56_i32 = arith.constant 56 : i32
    %5 = arith.muli %arg0, %c56_i32 : i32
    %6 = tpu.iota {dimensions = array<i32: 0>} : vector<56x256xi32>
    %7 = vector.broadcast %5 : i32 to vector<56x256xi32>
    %8 = arith.addi %6, %7 : vector<56x256xi32>
    %9 = vector.broadcast %3 : vector<1x256xi32> to vector<56x256xi32>
    %10 = arith.cmpi eq, %8, %9 : vector<56x256xi32>
    %11 = arith.extui %10 : vector<56x256xi1> to vector<56x256xi32>
    %12 = arith.sitofp %11 : vector<56x256xi32> to vector<56x256xf32>
    %c0_4 = arith.constant 0 : index
    %c0_5 = arith.constant 0 : index
    %13 = vector.load %arg9[%c0_4, %c0_5] : memref<56x17xf32, #tpu.memory_space<vmem>>, vector<56x17xf32>
    %cst = arith.constant dense<0.000000e+00> : vector<56x17xf32>
    %14 = tpu.matmul %12, %4, %cst {dimension_numbers = #tpu.dot_dimension_numbers<[1], [1], [0], [0], [0, 0, 1, 0], [], []>} : vector<56x256xf32>, vector<17x256xf32>, vector<56x17xf32> -> vector<56x17xf32>
    %15 = arith.addf %13, %14 : vector<56x17xf32>
    %c0_6 = arith.constant 0 : index
    %c0_7 = arith.constant 0 : index
    %16 = vector.load %arg9[%c0_6, %c0_7] : memref<56x17xf32, #tpu.memory_space<vmem>>, vector<56x17xf32>
    tpu.vector_store %arg9[%c0_6, %c0_7], %15 {strides = array<i32>} : memref<56x17xf32, #tpu.memory_space<vmem>>, vector<56x17xf32>,
    %17 = vector.extract_strided_slice %4 {offsets = [0, 0], sizes = [1, 256], strides = [1, 1]} : vector<17x256xf32> to vector<1x256xf32>
    %cst_8 = arith.constant 0xFF800000 : f32
    %18 = vector.shape_cast %17 : vector<1x256xf32> to vector<1x256xf32>
    %19 = vector.broadcast %18 : vector<1x256xf32> to vector<56x256xf32>
    %20 = vector.broadcast %cst_8 : f32 to vector<56x256xf32>
    %21 = arith.select %10, %19, %20 : vector<56x256xi1>, vector<56x256xf32>
    %cst_9 = arith.constant dense<0xFF800000> : vector<56xf32>
    %22 = vector.multi_reduction <maximumf>, %21, %cst_9 [1] : vector<56x256xf32> to vector<56xf32>
    %23 = vector.shape_cast %22 : vector<56xf32> to vector<56x1xf32>
    %24 = vector.extract_strided_slice %4 {offsets = [1, 0], sizes = [1, 256], strides = [1, 1]} : vector<17x256xf32> to vector<1x256xf32>
    %cst_10 = arith.constant 0xFF800000 : f32
    %25 = vector.shape_cast %24 : vector<1x256xf32> to vector<1x256xf32>
    %26 = vector.broadcast %25 : vector<1x256xf32> to vector<56x256xf32>
    %27 = vector.broadcast %cst_10 : f32 to vector<56x256xf32>
    %28 = arith.select %10, %26, %27 : vector<56x256xi1>, vector<56x256xf32>
    %cst_11 = arith.constant dense<0xFF800000> : vector<56xf32>
    %29 = vector.multi_reduction <maximumf>, %28, %cst_11 [1] : vector<56x256xf32> to vector<56xf32>
    %30 = vector.shape_cast %29 : vector<56xf32> to vector<56x1xf32>
    %31 = vector.extract_strided_slice %4 {offsets = [2, 0], sizes = [1, 256], strides = [1, 1]} : vector<17x256xf32> to vector<1x256xf32>
    %cst_12 = arith.constant 0xFF800000 : f32
    %32 = vector.shape_cast %31 : vector<1x256xf32> to vector<1x256xf32>
    %33 = vector.broadcast %32 : vector<1x256xf32> to vector<56x256xf32>
    %34 = vector.broadcast %cst_12 : f32 to vector<56x256xf32>
    %35 = arith.select %10, %33, %34 : vector<56x256xi1>, vector<56x256xf32>
    %cst_13 = arith.constant dense<0xFF800000> : vector<56xf32>
    %36 = vector.multi_reduction <maximumf>, %35, %cst_13 [1] : vector<56x256xf32> to vector<56xf32>
    %37 = vector.shape_cast %36 : vector<56xf32> to vector<56x1xf32>
    %38 = vector.extract_strided_slice %4 {offsets = [3, 0], sizes = [1, 256], strides = [1, 1]} : vector<17x256xf32> to vector<1x256xf32>
    %cst_14 = arith.constant 0xFF800000 : f32
    %39 = vector.shape_cast %38 : vector<1x256xf32> to vector<1x256xf32>
    %40 = vector.broadcast %39 : vector<1x256xf32> to vector<56x256xf32>
    %41 = vector.broadcast %cst_14 : f32 to vector<56x256xf32>
    %42 = arith.select %10, %40, %41 : vector<56x256xi1>, vector<56x256xf32>
    %cst_15 = arith.constant dense<0xFF800000> : vector<56xf32>
    %43 = vector.multi_reduction <maximumf>, %42, %cst_15 [1] : vector<56x256xf32> to vector<56xf32>
    %44 = vector.shape_cast %43 : vector<56xf32> to vector<56x1xf32>
    %45 = vector.extract_strided_slice %4 {offsets = [4, 0], sizes = [1, 256], strides = [1, 1]} : vector<17x256xf32> to vector<1x256xf32>
    %cst_16 = arith.constant 0xFF800000 : f32
    %46 = vector.shape_cast %45 : vector<1x256xf32> to vector<1x256xf32>
    %47 = vector.broadcast %46 : vector<1x256xf32> to vector<56x256xf32>
    %48 = vector.broadcast %cst_16 : f32 to vector<56x256xf32>
    %49 = arith.select %10, %47, %48 : vector<56x256xi1>, vector<56x256xf32>
    %cst_17 = arith.constant dense<0xFF800000> : vector<56xf32>
    %50 = vector.multi_reduction <maximumf>, %49, %cst_17 [1] : vector<56x256xf32> to vector<56xf32>
    %51 = vector.shape_cast %50 : vector<56xf32> to vector<56x1xf32>
    %52 = vector.extract_strided_slice %4 {offsets = [5, 0], sizes = [1, 256], strides = [1, 1]} : vector<17x256xf32> to vector<1x256xf32>
    %cst_18 = arith.constant 0xFF800000 : f32
    %53 = vector.shape_cast %52 : vector<1x256xf32> to vector<1x256xf32>
    %54 = vector.broadcast %53 : vector<1x256xf32> to vector<56x256xf32>
    %55 = vector.broadcast %cst_18 : f32 to vector<56x256xf32>
    %56 = arith.select %10, %54, %55 : vector<56x256xi1>, vector<56x256xf32>
    %cst_19 = arith.constant dense<0xFF800000> : vector<56xf32>
    %57 = vector.multi_reduction <maximumf>, %56, %cst_19 [1] : vector<56x256xf32> to vector<56xf32>
    %58 = vector.shape_cast %57 : vector<56xf32> to vector<56x1xf32>
    %59 = vector.extract_strided_slice %4 {offsets = [6, 0], sizes = [1, 256], strides = [1, 1]} : vector<17x256xf32> to vector<1x256xf32>
    %cst_20 = arith.constant 0xFF800000 : f32
    %60 = vector.shape_cast %59 : vector<1x256xf32> to vector<1x256xf32>
    %61 = vector.broadcast %60 : vector<1x256xf32> to vector<56x256xf32>
    %62 = vector.broadcast %cst_20 : f32 to vector<56x256xf32>
    %63 = arith.select %10, %61, %62 : vector<56x256xi1>, vector<56x256xf32>
    %cst_21 = arith.constant dense<0xFF800000> : vector<56xf32>
    %64 = vector.multi_reduction <maximumf>, %63, %cst_21 [1] : vector<56x256xf32> to vector<56xf32>
    %65 = vector.shape_cast %64 : vector<56xf32> to vector<56x1xf32>
    %66 = vector.extract_strided_slice %4 {offsets = [7, 0], sizes = [1, 256], strides = [1, 1]} : vector<17x256xf32> to vector<1x256xf32>
    %cst_22 = arith.constant 0xFF800000 : f32
    %67 = vector.shape_cast %66 : vector<1x256xf32> to vector<1x256xf32>
    %68 = vector.broadcast %67 : vector<1x256xf32> to vector<56x256xf32>
    %69 = vector.broadcast %cst_22 : f32 to vector<56x256xf32>
    %70 = arith.select %10, %68, %69 : vector<56x256xi1>, vector<56x256xf32>
    %cst_23 = arith.constant dense<0xFF800000> : vector<56xf32>
    %71 = vector.multi_reduction <maximumf>, %70, %cst_23 [1] : vector<56x256xf32> to vector<56xf32>
    %72 = vector.shape_cast %71 : vector<56xf32> to vector<56x1xf32>
    %73 = vector.extract_strided_slice %4 {offsets = [8, 0], sizes = [1, 256], strides = [1, 1]} : vector<17x256xf32> to vector<1x256xf32>
    %cst_24 = arith.constant 0xFF800000 : f32
    %74 = vector.shape_cast %73 : vector<1x256xf32> to vector<1x256xf32>
    %75 = vector.broadcast %74 : vector<1x256xf32> to vector<56x256xf32>
    %76 = vector.broadcast %cst_24 : f32 to vector<56x256xf32>
    %77 = arith.select %10, %75, %76 : vector<56x256xi1>, vector<56x256xf32>
    %cst_25 = arith.constant dense<0xFF800000> : vector<56xf32>
    %78 = vector.multi_reduction <maximumf>, %77, %cst_25 [1] : vector<56x256xf32> to vector<56xf32>
    %79 = vector.shape_cast %78 : vector<56xf32> to vector<56x1xf32>
    %80 = vector.extract_strided_slice %4 {offsets = [9, 0], sizes = [1, 256], strides = [1, 1]} : vector<17x256xf32> to vector<1x256xf32>
    %cst_26 = arith.constant 0xFF800000 : f32
    %81 = vector.shape_cast %80 : vector<1x256xf32> to vector<1x256xf32>
    %82 = vector.broadcast %81 : vector<1x256xf32> to vector<56x256xf32>
    %83 = vector.broadcast %cst_26 : f32 to vector<56x256xf32>
    %84 = arith.select %10, %82, %83 : vector<56x256xi1>, vector<56x256xf32>
    %cst_27 = arith.constant dense<0xFF800000> : vector<56xf32>
    %85 = vector.multi_reduction <maximumf>, %84, %cst_27 [1] : vector<56x256xf32> to vector<56xf32>
    %86 = vector.shape_cast %85 : vector<56xf32> to vector<56x1xf32>
    %87 = vector.extract_strided_slice %4 {offsets = [10, 0], sizes = [1, 256], strides = [1, 1]} : vector<17x256xf32> to vector<1x256xf32>
    %cst_28 = arith.constant 0xFF800000 : f32
    %88 = vector.shape_cast %87 : vector<1x256xf32> to vector<1x256xf32>
    %89 = vector.broadcast %88 : vector<1x256xf32> to vector<56x256xf32>
    %90 = vector.broadcast %cst_28 : f32 to vector<56x256xf32>
    %91 = arith.select %10, %89, %90 : vector<56x256xi1>, vector<56x256xf32>
    %cst_29 = arith.constant dense<0xFF800000> : vector<56xf32>
    %92 = vector.multi_reduction <maximumf>, %91, %cst_29 [1] : vector<56x256xf32> to vector<56xf32>
    %93 = vector.shape_cast %92 : vector<56xf32> to vector<56x1xf32>
    %94 = vector.extract_strided_slice %4 {offsets = [11, 0], sizes = [1, 256], strides = [1, 1]} : vector<17x256xf32> to vector<1x256xf32>
    %cst_30 = arith.constant 0xFF800000 : f32
    %95 = vector.shape_cast %94 : vector<1x256xf32> to vector<1x256xf32>
    %96 = vector.broadcast %95 : vector<1x256xf32> to vector<56x256xf32>
    %97 = vector.broadcast %cst_30 : f32 to vector<56x256xf32>
    %98 = arith.select %10, %96, %97 : vector<56x256xi1>, vector<56x256xf32>
    %cst_31 = arith.constant dense<0xFF800000> : vector<56xf32>
    %99 = vector.multi_reduction <maximumf>, %98, %cst_31 [1] : vector<56x256xf32> to vector<56xf32>
    %100 = vector.shape_cast %99 : vector<56xf32> to vector<56x1xf32>
    %101 = vector.extract_strided_slice %4 {offsets = [12, 0], sizes = [1, 256], strides = [1, 1]} : vector<17x256xf32> to vector<1x256xf32>
    %cst_32 = arith.constant 0xFF800000 : f32
    %102 = vector.shape_cast %101 : vector<1x256xf32> to vector<1x256xf32>
    %103 = vector.broadcast %102 : vector<1x256xf32> to vector<56x256xf32>
    %104 = vector.broadcast %cst_32 : f32 to vector<56x256xf32>
    %105 = arith.select %10, %103, %104 : vector<56x256xi1>, vector<56x256xf32>
    %cst_33 = arith.constant dense<0xFF800000> : vector<56xf32>
    %106 = vector.multi_reduction <maximumf>, %105, %cst_33 [1] : vector<56x256xf32> to vector<56xf32>
    %107 = vector.shape_cast %106 : vector<56xf32> to vector<56x1xf32>
    %108 = vector.extract_strided_slice %4 {offsets = [13, 0], sizes = [1, 256], strides = [1, 1]} : vector<17x256xf32> to vector<1x256xf32>
    %cst_34 = arith.constant 0xFF800000 : f32
    %109 = vector.shape_cast %108 : vector<1x256xf32> to vector<1x256xf32>
    %110 = vector.broadcast %109 : vector<1x256xf32> to vector<56x256xf32>
    %111 = vector.broadcast %cst_34 : f32 to vector<56x256xf32>
    %112 = arith.select %10, %110, %111 : vector<56x256xi1>, vector<56x256xf32>
    %cst_35 = arith.constant dense<0xFF800000> : vector<56xf32>
    %113 = vector.multi_reduction <maximumf>, %112, %cst_35 [1] : vector<56x256xf32> to vector<56xf32>
    %114 = vector.shape_cast %113 : vector<56xf32> to vector<56x1xf32>
    %115 = vector.extract_strided_slice %4 {offsets = [14, 0], sizes = [1, 256], strides = [1, 1]} : vector<17x256xf32> to vector<1x256xf32>
    %cst_36 = arith.constant 0xFF800000 : f32
    %116 = vector.shape_cast %115 : vector<1x256xf32> to vector<1x256xf32>
    %117 = vector.broadcast %116 : vector<1x256xf32> to vector<56x256xf32>
    %118 = vector.broadcast %cst_36 : f32 to vector<56x256xf32>
    %119 = arith.select %10, %117, %118 : vector<56x256xi1>, vector<56x256xf32>
    %cst_37 = arith.constant dense<0xFF800000> : vector<56xf32>
    %120 = vector.multi_reduction <maximumf>, %119, %cst_37 [1] : vector<56x256xf32> to vector<56xf32>
    %121 = vector.shape_cast %120 : vector<56xf32> to vector<56x1xf32>
    %122 = vector.extract_strided_slice %4 {offsets = [15, 0], sizes = [1, 256], strides = [1, 1]} : vector<17x256xf32> to vector<1x256xf32>
    %cst_38 = arith.constant 0xFF800000 : f32
    %123 = vector.shape_cast %122 : vector<1x256xf32> to vector<1x256xf32>
    %124 = vector.broadcast %123 : vector<1x256xf32> to vector<56x256xf32>
    %125 = vector.broadcast %cst_38 : f32 to vector<56x256xf32>
    %126 = arith.select %10, %124, %125 : vector<56x256xi1>, vector<56x256xf32>
    %cst_39 = arith.constant dense<0xFF800000> : vector<56xf32>
    %127 = vector.multi_reduction <maximumf>, %126, %cst_39 [1] : vector<56x256xf32> to vector<56xf32>
    %128 = vector.shape_cast %127 : vector<56xf32> to vector<56x1xf32>
    %129 = tpu.concatenate %23, %30, %37, %44, %51, %58, %65, %72, %79, %86, %93, %100, %107, %114, %121, %128 in 1 : vector<56x1xf32>, vector<56x1xf32>, vector<56x1xf32>, vector<56x1xf32>, vector<56x1xf32>, vector<56x1xf32>, vector<56x1xf32>, vector<56x1xf32>, vector<56x1xf32>, vector<56x1xf32>, vector<56x1xf32>, vector<56x1xf32>, vector<56x1xf32>, vector<56x1xf32>, vector<56x1xf32>, vector<56x1xf32> -> vector<56x16xf32>
    %c0_40 = arith.constant 0 : index
    %c0_41 = arith.constant 0 : index
    %130 = vector.load %arg10[%c0_40, %c0_41] : memref<56x16xf32, #tpu.memory_space<vmem>>, vector<56x16xf32>
    %131 = arith.maximumf %130, %129 : vector<56x16xf32>
    %c0_42 = arith.constant 0 : index
    %c0_43 = arith.constant 0 : index
    %132 = vector.load %arg10[%c0_42, %c0_43] : memref<56x16xf32, #tpu.memory_space<vmem>>, vector<56x16xf32>
    tpu.vector_store %arg10[%c0_42, %c0_43], %131 {strides = array<i32>} : memref<56x16xf32, #tpu.memory_space<vmem>>, vector<56x16xf32>,
    %c0_i32_44 = arith.constant 0 : i32
    %133 = arith.cmpi eq, %arg1, %c0_i32_44 : i32
    %134 = arith.extui %133 : i1 to i32
    %c0_i32_45 = arith.constant 0 : i32
    %135 = arith.cmpi ne, %134, %c0_i32_45 : i32
    scf.if %135 {
      %c0_46 = arith.constant 0 : index
      %c0_47 = arith.constant 0 : index
      %136 = vector.load %arg9[%c0_46, %c0_47] : memref<56x17xf32, #tpu.memory_space<vmem>>, vector<56x17xf32>
      %137 = vector.extract_strided_slice %136 {offsets = [0, 16], sizes = [56, 1], strides = [1, 1]} : vector<56x17xf32> to vector<56x1xf32>
      %cst_48 = arith.constant 0.000000e+00 : f32
      %138 = vector.broadcast %cst_48 : f32 to vector<56x1xf32>
      %139 = arith.cmpf ogt, %137, %138 : vector<56x1xf32>
      %140 = vector.extract_strided_slice %136 {offsets = [0, 0], sizes = [56, 16], strides = [1, 1]} : vector<56x17xf32> to vector<56x16xf32>
      %cst_49 = arith.constant 1.000000e+00 : f32
      %141 = vector.broadcast %cst_49 : f32 to vector<56x1xf32>
      %142 = arith.maximumf %137, %141 : vector<56x1xf32>
      %143 = vector.broadcast %142 : vector<56x1xf32> to vector<56x16xf32>
      %144 = arith.divf %140, %143 : vector<56x16xf32>
      %c0_50 = arith.constant 0 : index
      %c0_51 = arith.constant 0 : index
      %145 = vector.load %arg10[%c0_50, %c0_51] : memref<56x16xf32, #tpu.memory_space<vmem>>, vector<56x16xf32>
      %cst_52 = arith.constant 0.000000e+00 : f32
      %146 = vector.shape_cast %139 : vector<56x1xi1> to vector<56x1xi1>
      %147 = vector.broadcast %146 : vector<56x1xi1> to vector<56x16xi1>
      %148 = vector.broadcast %cst_52 : f32 to vector<56x16xf32>
      %149 = arith.select %147, %145, %148 : vector<56x16xi1>, vector<56x16xf32>
      %150 = tpu.concatenate %149, %144 in 0 : vector<56x16xf32>, vector<56x16xf32> -> vector<112x16xf32>
      %c0_53 = arith.constant 0 : index
      %c0_54 = arith.constant 0 : index
      %151 = vector.load %arg4[%c0_53, %c0_54] : memref<16x32xf32, #tpu.memory_space<vmem>>, vector<16x32xf32>
      %cst_55 = arith.constant dense<0.000000e+00> : vector<112x32xf32>
      %152 = tpu.matmul %150, %151, %cst_55 {dimension_numbers = #tpu.dot_dimension_numbers<[1], [0], [0], [1], [0, 0, 1, 1], [], []>} : vector<112x16xf32>, vector<16x32xf32>, vector<112x32xf32> -> vector<112x32xf32>
      %c0_56 = arith.constant 0 : index
      %c0_57 = arith.constant 0 : index
      %153 = vector.load %arg5[%c0_56, %c0_57] : memref<1x32xf32, #tpu.memory_space<vmem>>, vector<1x32xf32>
      %154 = vector.broadcast %153 : vector<1x32xf32> to vector<112x32xf32>
      %155 = arith.addf %152, %154 : vector<112x32xf32>
      %cst_58 = arith.constant 0.000000e+00 : f32
      %156 = vector.broadcast %cst_58 : f32 to vector<112x32xf32>
      %157 = arith.maximumf %155, %156 : vector<112x32xf32>
      %c0_59 = arith.constant 0 : index
      %c0_60 = arith.constant 0 : index
      %158 = vector.load %arg6[%c0_59, %c0_60] : memref<32x32xf32, #tpu.memory_space<vmem>>, vector<32x32xf32>
      %cst_61 = arith.constant dense<0.000000e+00> : vector<112x32xf32>
      %159 = tpu.matmul %157, %158, %cst_61 {dimension_numbers = #tpu.dot_dimension_numbers<[1], [0], [0], [1], [0, 0, 1, 1], [], []>} : vector<112x32xf32>, vector<32x32xf32>, vector<112x32xf32> -> vector<112x32xf32>
      %c0_62 = arith.constant 0 : index
      %c0_63 = arith.constant 0 : index
      %160 = vector.load %arg7[%c0_62, %c0_63] : memref<1x32xf32, #tpu.memory_space<vmem>>, vector<1x32xf32>
      %161 = vector.broadcast %160 : vector<1x32xf32> to vector<112x32xf32>
      %162 = arith.addf %159, %161 : vector<112x32xf32>
      %163 = vector.extract_strided_slice %162 {offsets = [0, 0], sizes = [56, 32], strides = [1, 1]} : vector<112x32xf32> to vector<56x32xf32>
      %164 = vector.extract_strided_slice %162 {offsets = [56, 0], sizes = [56, 32], strides = [1, 1]} : vector<112x32xf32> to vector<56x32xf32>
      %165 = arith.addf %163, %164 : vector<56x32xf32>
      %cst_64 = arith.constant 0.000000e+00 : f32
      %166 = vector.broadcast %cst_64 : f32 to vector<56x32xf32>
      %167 = arith.subf %166, %165 : vector<56x32xf32>
      %168 = math.exp %167 : vector<56x32xf32>
      %cst_65 = arith.constant 1.000000e+00 : f32
      %169 = vector.broadcast %cst_65 : f32 to vector<56x32xf32>
      %170 = arith.addf %169, %168 : vector<56x32xf32>
      %cst_66 = arith.constant 1.000000e+00 : f32
      %171 = vector.broadcast %cst_66 : f32 to vector<56x32xf32>
      %172 = arith.divf %171, %170 : vector<56x32xf32>
      %c0_67 = arith.constant 0 : index
      %c0_68 = arith.constant 0 : index
      %173 = vector.load %arg8[%c0_67, %c0_68] : memref<56x32xf32, #tpu.memory_space<vmem>>, vector<56x32xf32>
      tpu.vector_store %arg8[%c0_67, %c0_68], %172 {strides = array<i32>} : memref<56x32xf32, #tpu.memory_space<vmem>>, vector<56x32xf32>,
    } else {
    }
    return
  }
  func.func @transform_0(%arg0: i32, %arg1: i32) -> (i32, i32) {
    %c0_i32 = arith.constant 0 : i32
    %c0_i32_0 = arith.constant 0 : i32
    return %c0_i32, %arg1 : i32, i32
  }
  func.func @transform_1(%arg0: i32, %arg1: i32) -> (i32, i32) {
    %c0_i32 = arith.constant 0 : i32
    %c0_i32_0 = arith.constant 0 : i32
    return %c0_i32, %arg1 : i32, i32
  }
  func.func @transform_2(%arg0: i32, %arg1: i32) -> (i32, i32) {
    %c0_i32 = arith.constant 0 : i32
    %c0_i32_0 = arith.constant 0 : i32
    %c0_i32_1 = arith.constant 0 : i32
    return %c0_i32, %c0_i32_0 : i32, i32
  }
  func.func @transform_3(%arg0: i32, %arg1: i32) -> (i32, i32) {
    %c0_i32 = arith.constant 0 : i32
    %c0_i32_0 = arith.constant 0 : i32
    %c0_i32_1 = arith.constant 0 : i32
    return %c0_i32, %c0_i32_0 : i32, i32
  }
  func.func @transform_4(%arg0: i32, %arg1: i32) -> (i32, i32) {
    %c0_i32 = arith.constant 0 : i32
    %c0_i32_0 = arith.constant 0 : i32
    %c0_i32_1 = arith.constant 0 : i32
    return %c0_i32, %c0_i32_0 : i32, i32
  }
  func.func @transform_5(%arg0: i32, %arg1: i32) -> (i32, i32) {
    %c0_i32 = arith.constant 0 : i32
    %c0_i32_0 = arith.constant 0 : i32
    %c0_i32_1 = arith.constant 0 : i32
    return %c0_i32, %c0_i32_0 : i32, i32
  }
  func.func @transform_6(%arg0: i32, %arg1: i32) -> (i32, i32) {
    %c0_i32 = arith.constant 0 : i32
    %c0_i32_0 = arith.constant 0 : i32
    return %arg0, %c0_i32 : i32, i32
  }
}

</mosaic_0001>

<bundles_post_ra>
// kernel: tpu_custom_call.1
= control target key start
LH: loop header
LB: loop body
LE: loop exit
PB: predicated region body
PF: predicated region fallthrough
CT: control target
= control target key end

     0   :  { %11 = vsyncpa [#allocation5], 0  ;;  %s3251_s0 = inlined_call_operand.hbm [shape: s32[1,256], index: 0, kind: input, shape index: {}]   ;;  %s3252_s1 = inlined_call_operand.hbm [shape: f32[17,256], index: 1, kind: input, shape index: {}]   ;;  %s3253_s2 = inlined_call_operand.hbm [shape: f32[16,32], index: 2, kind: input, shape index: {}]   ;;  %s3254_s3 = inlined_call_operand.vmem [shape: f32[1,32], index: 3, kind: input, shape index: {}]   ;;  %s3255_s4 = inlined_call_operand.hbm [shape: f32[32,32], index: 4, kind: input, shape index: {}]   ;;  %s3256_s5 = inlined_call_operand.vmem [shape: f32[1,32], index: 5, kind: input, shape index: {}]   ;;  %s3257_s6 = inlined_call_operand.vmem [shape: f32[56,32], index: 6, kind: output, shape index: {}]  }
   0x1   :  { %12 = vsyncpa [#allocation7], 0  ;;  %s29_s23 = sshll.u32 %s3252_s1, 4  ;;  %s30_s23 = int_to_ptr.hbm [resolvable:$true] %s29_s23 }
   0x2   :  { %13 = vsyncpa [#allocation10], 0  ;;  %s1826_s24 = smov [#allocation6]   ;;  %s19_s28 = sshll.u32 %s3251_s0, 4  ;;  %s20_s28 = int_to_ptr.hbm [resolvable:$true] %s19_s28 }
   0x3   :  { %s31_s25 = sshll.u32 %s1826_s24, 4  ;;  %s1827_s29 = smov 256   ;;  %s32_s25 = int_to_ptr.vmem [resolvable:$true] %s31_s25 }
   0x4   :  { %s1828_s30 = smov 16   ;;  %s1829_s7 = smov [#allocation4]  }
   0x5   :  { %37 = dma.hbm_to_vmem [thread:$0]  %s30_s23, 768, %s32_s25, [#allocation7], %s1827_s29, %s1827_s29, %s1828_s30  }
   0x6   :  { %s21_s8 = sshll.u32 %s1829_s7, 4  ;;  %s42_s11 = sshll.u32 %s3253_s2, 4  ;;  %s22_s8 = int_to_ptr.vmem [resolvable:$true] %s21_s8  ;;  %s43_s11 = int_to_ptr.hbm [resolvable:$true] %s42_s11 }
   0x7   :  { %24 = dma.hbm_to_vmem [thread:$0]  %s20_s28, 32, %s22_s8, [#allocation5]  }
   0x8   :  { %s1830_s1 = smov [#allocation8]   ;;  %s57_s0 = sshll.u32 %s3255_s4, 4  ;;  %s58_s0 = int_to_ptr.hbm [resolvable:$true] %s57_s0 }
   0x9   :  { %s44_s12 = sshll.u32 %s1830_s1, 4  ;;  %s1831_s15 = smov 128   ;;  %s45_s12 = int_to_ptr.vmem [resolvable:$true] %s44_s12 }
   0xa   :  { %s1832_s16 = smov 8   ;;  %s1833_s17 = smov [#allocation9]  }
   0xb   :  { %50 = dma.hbm_to_vmem [thread:$0]  %s43_s11, 256, %s45_s12, [#allocation7], %s1831_s15, %s1831_s15, %s1832_s16  }
   0xc   :  { %s59_s18 = sshll.u32 %s1833_s17, 4  ;;  %s60_s18 = int_to_ptr.vmem [resolvable:$true] %s59_s18 }
   0xd   :  { %65 = dma.hbm_to_vmem [thread:$0]  %s58_s0, 512, %s60_s18, [#allocation10], %s1831_s15, %s1831_s15, %s1832_s16  }
   0xe   :  { %1820 = dma.done.wait [#allocation5], 32  }
   0xf   :  { %1821 = vsyncadd [#allocation5], 4294967264 }
  0x10   :  { %1822 = dma.done.wait [#allocation7], 1024  }
  0x11   :  { %1823 = vsyncadd [#allocation7], 4294966272 }
  0x12   :  { %1824 = dma.done.wait [#allocation10], 512  }
  0x13   :  { %1825 = vsyncadd [#allocation10], 4294966784  ;;  %v112_v0 = vlaneseq  ;;  %v104_v3 = vld [vmem:[#allocation4] sm:$0x3]  ;;  %v105_v4 = vld [vmem:[#allocation6] sm:$0xff]  ;;  %v3301_v57 = vmov 0 }
  0x14   :  { %v106_v5 = vld [vmem:[#allocation6 + $0x8] sm:$0xff]  ;;  %v1889_v6 = vperm.slane %v104_v3, 0  ;;  %v1891_v7 = vperm.slane %v104_v3, 1  ;;  %v1893_v8 = vperm.slane %v105_v4, 4  ;;  %v1897_v10 = vperm.slane %v105_v4, 2  ;;  %v1945_v33 = vld [vmem:[#allocation6 + $0x10] sm:$0xff] }
  0x15   :  { %v1886_v1 = vshrl.u32 %v112_v0, 7  ;;  %v1895_v9 = vperm.slane %v106_v5, 4  ;;  %v1899_v11 = vperm.slane %v106_v5, 2  ;;  %v1901_v12 = vperm.slane %v105_v4, 0  ;;  %v109_v14 = vld [vmem:[#allocation6 + $0x20] sm:$0x1] }
  0x16   :  { %v1903_v13 = vperm.slane %v106_v5, 0  ;;  %v1915_v17 = vperm.slane %v105_v4, 5  ;;  %v1917_v18 = vperm.slane %v106_v5, 5  ;;  %192 = vmatpush.xpose.msra.mxu0 %v109_v14  ;;  %v110_v19 = vld [vmem:[#allocation6 + $0x28] sm:$0x1]  ;;  %v1937_v29 = vperm.slane %v105_v4, 3 }
  0x17   :  { %v115_v2 = vadd.s32 16, %v1886_v1  ;;  %230 = vmatpush.xpose.msra.mxu1 %v110_v19  ;;  %v1939_v30 = vperm.slane %v106_v5, 3  ;;  %v1941_v31 = vperm.slane %v105_v4, 1  ;;  %v1943_v32 = vperm.slane %v106_v5, 1  ;;  %v1956_v37 = vld [vmem:[#allocation6 + $0x18] sm:$0xff] }
  0x18   :  { %v1970_v43 = vperm.slane %v1945_v33, 0  ;;  %v1973_v45 = vperm.slane %v1956_v37, 0  ;;  %v1975_v46 = vperm.slane %v105_v4, 7  ;;  %v1977_v47 = vperm.slane %v106_v5, 7 }
  0x19   :  { %vm1906_vm0 = vcmp.eq.s32.totalorder %v115_v2, %v1889_v6  ;;  %vm1911_vm1 = vcmp.eq.s32.totalorder %v115_v2, %v1891_v7  ;;  %v1979_v48 = vperm.slane %v105_v4, 6  ;;  %v1981_v49 = vperm.slane %v106_v5, 6 }
  0x1a   :  { %v424_v20 = vsel %vm1906_vm0, %v1893_v8, -inf  ;;  %v425_v21 = vsel %vm1911_vm1, %v1895_v9, -inf  ;;  %v350_v22 = vsel %vm1906_vm0, %v1897_v10, -inf  ;;  %v351_v23 = vsel %vm1911_vm1, %v1899_v11, -inf  ;;  %193 = vmatpush.xpose.msra.mxu0 %v1945_v33 }
  0x1b   :  { %v440_v24 = vmax.f32 %v424_v20, %v425_v21  ;;  %v366_v25 = vmax.f32 %v350_v22, %v351_v23  ;;  %v276_v26 = vsel %vm1906_vm0, %v1901_v12, -inf  ;;  %v277_v27 = vsel %vm1911_vm1, %v1903_v13, -inf  ;;  %231 = vmatpush.xpose.msra.mxu1 %v1956_v37  ;;  %3300 = vst [vmem:[#allocation14_spill] sm:$0xff] %v1981_v49 }
  0x1c   :  { %v292_v28 = vmax.f32 %v276_v26, %v277_v27  ;;  %v461_v34 = vsel %vm1906_vm0, %v1915_v17, -inf  ;;  %v462_v35 = vsel %vm1911_vm1, %v1917_v18, -inf  ;;  %v387_v36 = vsel %vm1906_vm0, %v1937_v29, -inf }
  0x1d   :  { %441 = vmax.xlane.f32.xlu2 %v440_v24  ;;  %367 = vmax.xlane.f32.xlu1 %v366_v25  ;;  %v388_v38 = vsel %vm1911_vm1, %v1939_v30, -inf  ;;  %v313_v39 = vsel %vm1906_vm0, %v1941_v31, -inf  ;;  %v314_v40 = vsel %vm1911_vm1, %v1943_v32, -inf  ;;  %v477_v41 = vmax.f32 %v461_v34, %v462_v35 }
  0x1e   :  { %293 = vmax.xlane.f32.xlu0 %v292_v28  ;;  %v403_v42 = vmax.f32 %v387_v36, %v388_v38  ;;  %v329_v44 = vmax.f32 %v313_v39, %v314_v40  ;;  %194 = vmatpush.xpose.msra.mxu0 %v105_v4  ;;  %v572_v50 = vsel %vm1906_vm0, %v1970_v43, -inf  ;;  %v573_v51 = vsel %vm1911_vm1, %v1973_v45, -inf }
  0x1f   :  { %232 = vmatpush.xpose.msra.mxu1 %v106_v5  ;;  %v535_v52 = vsel %vm1906_vm0, %v1975_v46, -inf  ;;  %v536_v53 = vsel %vm1911_vm1, %v1977_v47, -inf  ;;  %v498_v54 = vsel %vm1906_vm0, %v1979_v48, -inf  ;;  %v499_v55 = vsel %vm1911_vm1, %v1981_v49, -inf }
  0x20   :  { %v116_v56 = vadd.s32 24, %v1886_v1  ;;  %vm2004_vm2 = vcmp.eq.s32.totalorder %v1886_v1, %v1891_v7  ;;  %v588_v58 = vmax.f32 %v572_v50, %v573_v51  ;;  %v551_v59 = vmax.f32 %v535_v52, %v536_v53 }
  0x21   :  { %v3302_v57 = vsel %vm2004_vm2, 4294967295, %v3301_v57  ;;  %v2009_v60 = vperm.slane %v1945_v33, 1  ;;  %v1834_v61 = vmov 1.0   ;;  %v514_v62 = vmax.f32 %v498_v54, %v499_v55 }
  0x22   :  { %3303 = vst [vmem:[#allocation15_spill] sm:$0xff] %v3302_v57  ;;  %1623 = vmatmul.msk.f32.vlgmr.msra.gmra.mxu1 %vm2004_vm2, %v1834_v61  ;;  %v2015_v63 = vperm.slane %v1956_v37, 1  ;;  %vm2018_vm3 = vcmp.eq.s32.totalorder %v116_v56, %v1889_v6  ;;  %vm2023_vm4 = vcmp.eq.s32.totalorder %v116_v56, %v1891_v7  ;;  %vm2029_vm5 = vcmp.eq.s32.totalorder %v1886_v1, %v1889_v6 }
  0x23   :  { %v3308_v3 = vmov 0  ;;  %v114_v4 = vadd.s32 8, %v1886_v1  ;;  %v609_v5 = vsel %vm1906_vm0, %v2009_v60, -inf  ;;  %v315_v19 = vsel %vm2018_vm3, %v1941_v31, -inf  ;;  %1616 = vmatmul.msk.f32.vlgmr.msra.gmra.mxu0 %vm2029_vm5, %v1834_v61 }
  0x24   :  { %v3309_v3 = vsel %vm2029_vm5, 4294967295, %v3308_v3  ;;  %v610_v14 = vsel %vm1911_vm1, %v2015_v63, -inf  ;;  %v316_v20 = vsel %vm2023_vm4, %v1943_v32, -inf  ;;  %v3311_v21 = vmov 0 }
  0x25   :  { %478 = vmax.xlane.f32.xlu2 %v477_v41  ;;  %404 = vmax.xlane.f32.xlu1 %v403_v42  ;;  %3310 = vst [vmem:[#allocation16_spill] sm:$0xff] %v3309_v3  ;;  %vm2050_vm6 = vcmp.eq.s32.totalorder %v114_v4, %v1891_v7  ;;  %v278_v22 = vsel %vm2018_vm3, %v1901_v12, -inf  ;;  %v279_v23 = vsel %vm2023_vm4, %v1903_v13, -inf  ;;  %v625_v24 = vmax.f32 %v609_v5, %v610_v14 }
  0x26   :  { %330 = vmax.xlane.f32.xlu0 %v329_v44  ;;  %v3312_v21 = vsel %vm2050_vm6, 4294967295, %v3311_v21  ;;  %v332_v25 = vmax.f32 %v315_v19, %v316_v20  ;;  %v295_v26 = vmax.f32 %v278_v22, %v279_v23  ;;  %v2064_v27 = vperm.slane %v1945_v33, 2 }
  0x27   :  { %3313 = vst [vmem:[#allocation17_spill] sm:$0xff] %v3312_v21  ;;  %v2067_v28 = vperm.slane %v1956_v37, 2  ;;  %vm2070_vm7 = vcmp.eq.s32.totalorder %v114_v4, %v1889_v6  ;;  %v3314_v34 = vmov 0  ;;  %v389_v35 = vsel %vm2018_vm3, %v1937_v29, -inf }
  0x28   :  { %v3315_v34 = vsel %vm2070_vm7, 4294967295, %v3314_v34  ;;  %v390_v36 = vsel %vm2023_vm4, %v1939_v30, -inf  ;;  %v646_v38 = vsel %vm1906_vm0, %v2064_v27, -inf  ;;  %v352_v40 = vsel %vm2018_vm3, %v1897_v10, -inf }
  0x29   :  { %3316 = vst [vmem:[#allocation18_spill] sm:$0xff] %v3315_v34  ;;  %v647_v39 = vsel %vm1911_vm1, %v2067_v28, -inf  ;;  %v353_v41 = vsel %vm2023_vm4, %v1899_v11, -inf  ;;  %v406_v42 = vmax.f32 %v389_v35, %v390_v36  ;;  %v2099_v51 = vperm.slane %v1945_v33, 4 }
  0x2a   :  { %1624 = vmatmul.msk.f32.gmra.mxu1 %vm2050_vm6, %v1834_v61  ;;  %v662_v44 = vmax.f32 %v646_v38, %v647_v39  ;;  %v369_v50 = vmax.f32 %v352_v40, %v353_v41  ;;  %v2102_v52 = vperm.slane %v1956_v37, 4  ;;  %v2105_v53 = vperm.slane %v1945_v33, 3 }
  0x2b   :  { %1617 = vmatmul.msk.f32.gmra.mxu0 %vm2070_vm7, %v1834_v61  ;;  %v2108_v54 = vperm.slane %v1956_v37, 3  ;;  %v720_v55 = vsel %vm1906_vm0, %v2099_v51, -inf  ;;  %v2135_v20 = vperm.slane %v1945_v33, 5  ;;  %v2138_v22 = vperm.slane %v1956_v37, 5 }
  0x2c   :  { %v721_v56 = vsel %vm1911_vm1, %v2102_v52, -inf  ;;  %v117_v23 = vadd.s32 32, %v1886_v1  ;;  %v463_v36 = vsel %vm2018_vm3, %v1915_v17, -inf  ;;  %v464_v38 = vsel %vm2023_vm4, %v1917_v18, -inf }
  0x2d   :  { %589 = vmax.xlane.f32.xlu2 %v588_v58  ;;  %552 = vmax.xlane.f32.xlu1 %v551_v59  ;;  %v426_v58 = vsel %vm2018_vm3, %v1893_v8, -inf  ;;  %v427_v59 = vsel %vm2023_vm4, %v1895_v9, -inf  ;;  %v684_v4 = vsel %vm1911_vm1, %v2108_v54, -inf  ;;  %v736_v5 = vmax.f32 %v720_v55, %v721_v56  ;;  %3317 = vst [vmem:[#allocation19_spill] sm:$0xff] %v2138_v22 }
  0x2e   :  { %515 = vmax.xlane.f32.xlu0 %v514_v62  ;;  %v683_v62 = vsel %vm1906_vm0, %v2105_v53, -inf  ;;  %v443_v14 = vmax.f32 %v426_v58, %v427_v59  ;;  %v758_v35 = vsel %vm1911_vm1, %v2138_v22, -inf  ;;  %vm2163_vm8 = vcmp.eq.s32.totalorder %v117_v23, %v1891_v7 }
  0x2f   :  { %v699_v19 = vmax.f32 %v683_v62, %v684_v4  ;;  %v2177_v55 = vperm.slane %v1945_v33, 6  ;;  %v2180_v56 = vperm.slane %v1956_v37, 6  ;;  %vm2189_vm9 = vcmp.eq.s32.totalorder %v117_v23, %v1889_v6 }
  0x30   :  { %v759_v4 = vsel %vm2018_vm3, %v2135_v20, -inf  ;;  %v317_v15 = vsel %vm2189_vm9, %v1941_v31, -inf  ;;  %v318_v16 = vsel %vm2163_vm8, %v1943_v32, -inf  ;;  %v465_v0 = vsel %vm2189_vm9, %v1915_v17, -inf }
  0x31   :  { %3322 = vst [vmem:[#allocation22_spill] sm:$0xff] %v2177_v55  ;;  %v466_v2 = vsel %vm2163_vm8, %v1917_v18, -inf  ;;  %vm88_vm14 = vcmask 138240   ;;  %vm3280_vm15 = vcmask 130048   ;;  %v1836_v34 = vmov -inf  }
  0x32   :  { %1625 = vmatmul.msk.f32.gmra.mxu1 %vm1911_vm1, %v1834_v61  ;;  %3323 = vst [vmem:[#allocation23_spill] sm:$0xff] %v2180_v56 }
  0x33   :  { %1618 = vmatmul.msk.f32.gmra.mxu0 %vm1906_vm0, %v1834_v61  ;;  %99 = vst.msk [vmem:[#allocation3 + $0x10] sm:$0xff] %vm3280_vm15, %v1836_v34 }
  0x34   :  { %97 = vst.msk [vmem:[#allocation3] sm:$0xff] %vm3280_vm15, %v1836_v34 }
  0x35   :  { %626 = vmax.xlane.f32.xlu2 %v625_v24  ;;  %333 = vmax.xlane.f32.xlu1 %v332_v25  ;;  %v500_v24 = vsel %vm2018_vm3, %v1979_v48, -inf  ;;  %v501_v25 = vsel %vm2023_vm4, %v1981_v49, -inf  ;;  %98 = vst.msk [vmem:[#allocation3 + $0x8] sm:$0xff] %vm3280_vm15, %v1836_v34 }
  0x36   :  { %296 = vmax.xlane.f32.xlu0 %v295_v26  ;;  %v757_v26 = vsel %vm1906_vm0, %v2135_v20, -inf  ;;  %v517_v40 = vmax.f32 %v500_v24, %v501_v25  ;;  %100 = vst.msk [vmem:[#allocation3 + $0x18] sm:$0xff] %vm3280_vm15, %v1836_v34 }
  0x37   :  { %v773_v41 = vmax.f32 %v757_v26, %v758_v35  ;;  %v722_v35 = vsel %vm2018_vm3, %v2099_v51, -inf  ;;  %101 = vst.msk [vmem:[#allocation3 + $0x20] sm:$0xff] %vm3280_vm15, %v1836_v34 }
  0x38   :  { %102 = vst.msk [vmem:[#allocation3 + $0x28] sm:$0xff] %vm3280_vm15, %v1836_v34 }
  0x39   :  { %103 = vst.msk [vmem:[#allocation3 + $0x30] sm:$0xff] %vm3280_vm15, %v1836_v34 }
  0x3a   :  { %1626 = vmatmul.msk.f32.gmra.mxu1 %vm2023_vm4, %v1834_v61 }
  0x3b   :  { %1619 = vmatmul.msk.f32.gmra.mxu0 %vm2018_vm3, %v1834_v61 }
  0x3d   :  { %407 = vmax.xlane.f32.xlu2 %v406_v42  ;;  %663 = vmax.xlane.f32.xlu1 %v662_v44  ;;  %v2168_v42 = vperm.slane %v1945_v33, 7  ;;  %v2171_v44 = vperm.slane %v1956_v37, 7  ;;  %v537_v33 = vsel %vm2018_vm3, %v1975_v46, -inf  ;;  %v538_v37 = vsel %vm2023_vm4, %v1977_v47, -inf }
  0x3e   :  { %370 = vmax.xlane.f32.xlu0 %v369_v50  ;;  %v480_v50 = vmax.f32 %v463_v36, %v464_v38  ;;  %v554_v25 = vmax.f32 %v537_v33, %v538_v37  ;;  %v723_v36 = vsel %vm2023_vm4, %v2102_v52, -inf }
  0x3f   :  { %3320 = vst [vmem:[#allocation20_spill] sm:$0xff] %v2168_v42  ;;  %v831_v58 = vsel %vm1906_vm0, %v2168_v42, -inf  ;;  %v832_v59 = vsel %vm1911_vm1, %v2171_v44, -inf  ;;  %v739_v38 = vmax.f32 %v722_v35, %v723_v36  ;;  %v118_v35 = vadd.s32 40, %v1886_v1 }
  0x40   :  { %3321 = vst [vmem:[#allocation21_spill] sm:$0xff] %v2171_v44  ;;  %v847_v24 = vmax.f32 %v831_v58, %v832_v59  ;;  %v575_v58 = vsel %vm2023_vm4, %v1973_v45, -inf  ;;  %v335_v59 = vmax.f32 %v317_v15, %v318_v16  ;;  %v611_v36 = vsel %vm2018_vm3, %v2009_v60, -inf }
  0x41   :  { %v612_v15 = vsel %vm2023_vm4, %v2015_v63, -inf  ;;  %vm2266_vm10 = vcmp.eq.s32.totalorder %v118_v35, %v1889_v6  ;;  %vm2271_vm11 = vcmp.eq.s32.totalorder %v118_v35, %v1891_v7 }
  0x42   :  { %1627 = vmatmul.msk.f32.gmra.mxu1 %vm2163_vm8, %v1834_v61  ;;  %v541_v39 = vsel %vm2266_vm10, %v1975_v46, -inf }
  0x43   :  { %1620 = vmatmul.msk.f32.gmra.mxu0 %vm2189_vm9, %v1834_v61 }
  0x45   :  { %737 = vmax.xlane.f32.xlu2 %v736_v5  ;;  %444 = vmax.xlane.f32.xlu1 %v443_v14  ;;  %v760_v5 = vsel %vm2023_vm4, %v2138_v22, -inf  ;;  %v794_v14 = vsel %vm1906_vm0, %v2177_v55, -inf  ;;  %vm3278_vm0 = vcmask 7168  }
  0x46   :  { %700 = vmax.xlane.f32.xlu0 %v699_v19  ;;  %v795_v19 = vsel %vm1911_vm1, %v2180_v56, -inf  ;;  %v2214_v23 = vmax.f32 %v759_v4, %v760_v5  ;;  %v796_v4 = vsel %vm2018_vm3, %v2177_v55, -inf  ;;  %v797_v5 = vsel %vm2023_vm4, %v2180_v56, -inf }
  0x47   :  { %v810_v26 = vmax.f32 %v794_v14, %v795_v19  ;;  %v813_v14 = vmax.f32 %v796_v4, %v797_v5  ;;  %v648_v19 = vsel %vm2018_vm3, %v2064_v27, -inf  ;;  %v428_v4 = vsel %vm2189_vm9, %v1893_v8, -inf }
  0x48   :  { %v429_v5 = vsel %vm2163_vm8, %v1895_v9, -inf  ;;  %vm3277_vm1 = vcmask 15360  }
  0x49   :  { %v446_v35 = vmax.f32 %v428_v4, %v429_v5  ;;  %v283_v4 = vsel %vm2271_vm11, %v1903_v13, -inf  ;;  %v576_v5 = vsel %vm2189_vm9, %v1970_v43, -inf }
  0x4a   :  { %1628 = vmatmul.msk.f32.gmra.mxu1 %vm2271_vm11, %v1834_v61 }
  0x4b   :  { %1621 = vmatmul.msk.f32.gmra.mxu0 %vm2266_vm10, %v1834_v61 }
  0x4d   :  { %518 = vmax.xlane.f32.xlu2 %v517_v40  ;;  %774 = vmax.xlane.f32.xlu1 %v773_v41  ;;  %v280_v40 = vsel %vm2189_vm9, %v1901_v12, -inf  ;;  %v281_v41 = vsel %vm2163_vm8, %v1903_v13, -inf }
  0x4e   :  { %481 = vmax.xlane.f32.xlu0 %v480_v50  ;;  %v574_v50 = vsel %vm2018_vm3, %v1970_v43, -inf  ;;  %v298_v33 = vmax.f32 %v280_v40, %v281_v41 }
  0x4f   :  { %v591_v37 = vmax.f32 %v574_v50, %v575_v58  ;;  %v628_v58 = vmax.f32 %v611_v36, %v612_v15 }
  0x55   :  { %848 = vmax.xlane.f32.xlu2 %v847_v24  ;;  %555 = vmax.xlane.f32.xlu1 %v554_v25  ;;  %v649_v24 = vsel %vm2023_vm4, %v2067_v28, -inf  ;;  %v354_v25 = vsel %vm2189_vm9, %v1897_v10, -inf }
  0x56   :  { %811 = vmax.xlane.f32.xlu0 %v810_v26  ;;  %v355_v26 = vsel %vm2163_vm8, %v1899_v11, -inf  ;;  %v665_v41 = vmax.f32 %v648_v19, %v649_v24  ;;  %v685_v19 = vsel %vm2018_vm3, %v2105_v53, -inf  ;;  %v686_v24 = vsel %vm2023_vm4, %v2108_v54, -inf }
  0x57   :  { %v372_v50 = vmax.f32 %v354_v25, %v355_v26  ;;  %v391_v25 = vsel %vm2189_vm9, %v1937_v29, -inf  ;;  %v392_v26 = vsel %vm2163_vm8, %v1939_v30, -inf  ;;  %v702_v36 = vmax.f32 %v685_v19, %v686_v24 }
  0x58   :  { %v409_v15 = vmax.f32 %v391_v25, %v392_v26  ;;  %v577_v19 = vsel %vm2163_vm8, %v1973_v45, -inf  ;;  %v357_v26 = vsel %vm2271_vm11, %v1899_v11, -inf }
  0x59   :  { %v594_v25 = vmax.f32 %v576_v5, %v577_v19 }
  0x5d   :  { %336 = vmax.xlane.f32.xlu2 %v335_v59  ;;  %299 = vmax.xlane.f32.xlu1 %v298_v33  ;;  %v833_v59 = vsel %vm2018_vm3, %v2168_v42, -inf  ;;  %v834_v33 = vsel %vm2023_vm4, %v2171_v44, -inf  ;;  %vm3272_vm3 = vcmask 23552   ;;  %vm3275_vm4 = vcmask 31744  }
  0x5e   :  { %592 = vmax.xlane.f32.xlu0 %v591_v37  ;;  %v850_v37 = vmax.f32 %v833_v59, %v834_v33 }
  0x65   :  { %666 = vmax.xlane.f32.xlu2 %v665_v41  ;;  %373 = vmax.xlane.f32.xlu1 %v372_v50  ;;  %v119_v41 = vadd.s32 48, %v1886_v1  ;;  %v483_v50 = vmax.f32 %v465_v0, %v466_v2  ;;  %v539_v1 = vsel %vm2189_vm9, %v1975_v46, -inf }
  0x66   :  { %629 = vmax.xlane.f32.xlu0 %v628_v58 }
  0x67   :  { %vm2313_vm12 = vcmp.eq.s32.totalorder %v119_v41, %v1889_v6  ;;  %vm2318_vm13 = vcmp.eq.s32.totalorder %v119_v41, %v1891_v7  ;;  %v540_v6 = vsel %vm2163_vm8, %v1977_v47, -inf  ;;  %v502_v7 = vsel %vm2189_vm9, %v1979_v48, -inf }
  0x68   :  { %1622 = vmatmul.msk.f32.gmra.mxu0 %vm2313_vm12, %v1834_v61  ;;  %1629 = vmatmul.msk.f32.gmra.mxu1 %vm2318_vm13, %v1834_v61  ;;  %v503_v61 = vsel %vm2163_vm8, %v1981_v49, -inf  ;;  %v557_v33 = vmax.f32 %v539_v1, %v540_v6  ;;  %v394_v1 = vsel %vm2271_vm11, %v1939_v30, -inf  ;;  %v798_v6 = vsel %vm2189_vm9, %v2177_v55, -inf }
  0x69   :  { %v285_v34 = vsel %vm2318_vm13, %v1903_v13, -inf  ;;  %v358_v16 = vsel %vm2313_vm12, %v1897_v10, -inf  ;;  %v359_v40 = vsel %vm2318_vm13, %v1899_v11, -inf }
  0x6d   :  { %447 = vmax.xlane.f32.xlu2 %v446_v35  ;;  %703 = vmax.xlane.f32.xlu1 %v702_v36  ;;  %v613_v35 = vsel %vm2189_vm9, %v2009_v60, -inf  ;;  %v614_v36 = vsel %vm2163_vm8, %v2015_v63, -inf }
  0x6e   :  { %410 = vmax.xlane.f32.xlu0 %v409_v15  ;;  %v320_v15 = vsel %vm2271_vm11, %v1943_v32, -inf  ;;  %v631_v2 = vmax.f32 %v613_v35, %v614_v36  ;;  %v690_v35 = vsel %vm2271_vm11, %v2108_v54, -inf  ;;  %v687_v36 = vsel %vm2189_vm9, %v2105_v53, -inf }
  0x75   :  { %777 = vmax.xlane.f32.xlu2 %v2214_v23  ;;  %484 = vmax.xlane.f32.xlu1 %v483_v50  ;;  %v520_v23 = vmax.f32 %v502_v7, %v503_v61  ;;  %v393_v50 = vsel %vm2266_vm10, %v1937_v29, -inf  ;;  %v799_v7 = vsel %vm2163_vm8, %v2180_v56, -inf  ;;  %v650_v61 = vsel %vm2189_vm9, %v2064_v27, -inf }
  0x76   :  { %740 = vmax.xlane.f32.xlu0 %v739_v38  ;;  %v282_v38 = vsel %vm2266_vm10, %v1901_v12, -inf  ;;  %v412_v5 = vmax.f32 %v393_v50, %v394_v1  ;;  %v816_v19 = vmax.f32 %v798_v6, %v799_v7  ;;  %v467_v6 = vsel %vm2266_vm10, %v1915_v17, -inf }
  0x77   :  { %v301_v24 = vmax.f32 %v282_v38, %v283_v4  ;;  %v468_v7 = vsel %vm2271_vm11, %v1917_v18, -inf }
  0x7d   :  { %558 = vmax.xlane.f32.xlu2 %v557_v33  ;;  %814 = vmax.xlane.f32.xlu1 %v813_v14  ;;  %v356_v14 = vsel %vm2266_vm10, %v1897_v10, -inf  ;;  %v651_v33 = vsel %vm2163_vm8, %v2067_v28, -inf }
  0x7e   :  { %521 = vmax.xlane.f32.xlu0 %v520_v23  ;;  %v375_v0 = vmax.f32 %v356_v14, %v357_v26  ;;  %v431_v14 = vsel %vm2271_vm11, %v1895_v9, -inf  ;;  %v689_v26 = vsel %vm2266_vm10, %v2105_v53, -inf }
  0x7f   :  { %v708_v50 = vmax.f32 %v689_v26, %v690_v35  ;;  %v486_v26 = vmax.f32 %v467_v6, %v468_v7  ;;  %v764_v6 = vsel %vm2271_vm11, %v2138_v22, -inf }
  0x85   :  { %302 = vmax.xlane.f32.xlu2 %v301_v24  ;;  %595 = vmax.xlane.f32.xlu1 %v594_v25  ;;  %v668_v24 = vmax.f32 %v650_v61, %v651_v33  ;;  %v430_v25 = vsel %vm2266_vm10, %v1893_v8, -inf  ;;  %v726_v61 = vsel %vm2266_vm10, %v2099_v51, -inf  ;;  %v727_v33 = vsel %vm2271_vm11, %v2102_v52, -inf }
  0x86   :  { %851 = vmax.xlane.f32.xlu0 %v850_v37  ;;  %v319_v37 = vsel %vm2266_vm10, %v1941_v31, -inf  ;;  %v745_v35 = vmax.f32 %v726_v61, %v727_v33  ;;  %v761_v61 = vsel %vm2189_vm9, %v2135_v20, -inf  ;;  %v762_v33 = vsel %vm2163_vm8, %v2138_v22, -inf }
  0x87   :  { %v338_v41 = vmax.f32 %v319_v37, %v320_v15  ;;  %v688_v37 = vsel %vm2163_vm8, %v2108_v54, -inf  ;;  %v779_v21 = vmax.f32 %v761_v61, %v762_v33 }
  0x88   :  { %v705_v1 = vmax.f32 %v687_v36, %v688_v37  ;;  %v1835_v37 = vmov 0.0  }
  0x89   :  { %89 = vst.msk [vmem:[#allocation2] sm:$0xff] %vm88_vm14, %v1835_v37 }
  0x8a   :  { %90 = vst.msk [vmem:[#allocation2 + $0x8] sm:$0xff] %vm88_vm14, %v1835_v37 }
  0x8b   :  { %91 = vst.msk [vmem:[#allocation2 + $0x10] sm:$0xff] %vm88_vm14, %v1835_v37 }
  0x8c   :  { %92 = vst.msk [vmem:[#allocation2 + $0x18] sm:$0xff] %vm88_vm14, %v1835_v37 }
  0x8d   :  { %376 = vmax.xlane.f32.xlu2 %v375_v0  ;;  %632 = vmax.xlane.f32.xlu1 %v631_v2  ;;  %93 = vst.msk [vmem:[#allocation2 + $0x20] sm:$0xff] %vm88_vm14, %v1835_v37 }
  0x8e   :  { %339 = vmax.xlane.f32.xlu0 %v338_v41  ;;  %v449_v41 = vmax.f32 %v430_v25, %v431_v14  ;;  %94 = vst.msk [vmem:[#allocation2 + $0x28] sm:$0xff] %vm88_vm14, %v1835_v37 }
  0x8f   :  { %95 = vst.msk [vmem:[#allocation2 + $0x30] sm:$0xff] %vm88_vm14, %v1835_v37  ;;  %v836_v37 = vsel %vm2163_vm8, %v2171_v44, -inf }
  0x90   :  { %v2389_v23 = vpop.xlane.xlu2 %441  ;;  %v2391_v38 = vpop.xlane.xlu1 %367  ;;  %v172_v3 = vld [vmem:[#allocation2] sm:$0xff] }
  0x91   :  { %v2393_v4 = vpop.xlane.xlu0 %293 }
  0x95   :  { %413 = vmax.xlane.f32.xlu2 %v412_v5  ;;  %817 = vmax.xlane.f32.xlu1 %v816_v19  ;;  %v724_v5 = vsel %vm2189_vm9, %v2099_v51, -inf  ;;  %v725_v19 = vsel %vm2163_vm8, %v2102_v52, -inf  ;;  %vm3274_vm8 = vcmask 39936  }
  0x96   :  { %669 = vmax.xlane.f32.xlu0 %v668_v24  ;;  %v742_v36 = vmax.f32 %v724_v5, %v725_v19 }
  0x98   :  { %v2413_v15 = vpop.xlane.xlu2 %478  ;;  %v2415_v0 = vpop.xlane.xlu1 %404 }
  0x99   :  { %v2417_v2 = vpop.xlane.xlu0 %330 }
  0x9d   :  { %450 = vmax.xlane.f32.xlu2 %v449_v41  ;;  %709 = vmax.xlane.f32.xlu1 %v708_v50  ;;  %v504_v41 = vsel %vm2266_vm10, %v1979_v48, -inf  ;;  %v505_v50 = vsel %vm2271_vm11, %v1981_v49, -inf }
  0x9e   :  { %706 = vmax.xlane.f32.xlu0 %v705_v1  ;;  %v763_v1 = vsel %vm2266_vm10, %v2135_v20, -inf }
  0x9f   :  { %v234_v7 = vpop.f32.mrf.mxu1 }
  0xa0   :  { %v2437_v24 = vpop.xlane.xlu2 %589  ;;  %v2439_v25 = vpop.xlane.xlu1 %552 }
  0xa1   :  { %v2441_v14 = vpop.xlane.xlu0 %515  ;;  %v196_v57 = vpop.f32.mrf.mxu0 }
  0xa2   :  { %v235_v49 = vadd.f32 %v234_v7, %v196_v57  ;;  %v801_v57 = vsel %vm2271_vm11, %v2180_v56, -inf }
  0xa5   :  { %487 = vmax.xlane.f32.xlu2 %v486_v26  ;;  %746 = vmax.xlane.f32.xlu1 %v745_v35  ;;  %v523_v35 = vmax.f32 %v504_v41, %v505_v50  ;;  %v835_v41 = vsel %vm2189_vm9, %v2168_v42, -inf  ;;  %v800_v50 = vsel %vm2266_vm10, %v2177_v55, -inf  ;;  %vm3273_vm9 = vcmask 48128  }
  0xa6   :  { %743 = vmax.xlane.f32.xlu0 %v742_v36  ;;  %v782_v36 = vmax.f32 %v763_v1, %v764_v6  ;;  %v255_v1 = vadd.f32 %v235_v49, %v172_v3  ;;  %v542_v6 = vsel %vm2271_vm11, %v1977_v47, -inf  ;;  %v853_v61 = vmax.f32 %v835_v41, %v836_v37 }
  0xa7   :  { %v237_v62 = vpop.f32.mrf.mxu1  ;;  %v560_v33 = vmax.f32 %v541_v39, %v542_v6  ;;  %v284_v41 = vsel %vm2313_vm12, %v1901_v12, -inf }
  0xa8   :  { %v2466_v5 = vpop.xlane.xlu2 %626  ;;  %v2468_v19 = vpop.xlane.xlu1 %333  ;;  %263 = vst.msk [vmem:[#allocation2] sm:$0xff] %vm88_vm14, %v255_v1  ;;  %v304_v6 = vmax.f32 %v284_v41, %v285_v34  ;;  %v616_v41 = vsel %vm2271_vm11, %v2015_v63, -inf }
  0xa9   :  { %v2471_v26 = vpop.xlane.xlu0 %296 }
  0xad   :  { %524 = vmax.xlane.f32.xlu2 %v523_v35  ;;  %783 = vmax.xlane.f32.xlu1 %v782_v36  ;;  %v199_v35 = vpop.f32.mrf.mxu0  ;;  %v173_v36 = vld [vmem:[#allocation2 + $0x8] sm:$0xff] }
  0xae   :  { %780 = vmax.xlane.f32.xlu0 %v779_v21  ;;  %v865_v21 = vsel %vm3278_vm0, %v2393_v4, %v2417_v2  ;;  %v819_v4 = vmax.f32 %v800_v50, %v801_v57  ;;  %v238_v56 = vadd.f32 %v237_v62, %v199_v35  ;;  %v578_v50 = vsel %vm2266_vm10, %v1970_v43, -inf  ;;  %v174_v35 = vld [vmem:[#allocation2 + $0x10] sm:$0xff] }
  0xaf   :  { %v873_v2 = vsel %vm3277_vm1, %v865_v21, %v2391_v38  ;;  %v837_v38 = vsel %vm2266_vm10, %v2168_v42, -inf  ;;  %v579_v57 = vsel %vm2271_vm11, %v1973_v45, -inf  ;;  %v240_v1 = vpop.f32.mrf.mxu1  ;;  %vm950_vm1 = vcmask 97280  }
  0xb0   :  { %v2501_v7 = vpop.xlane.xlu2 %407  ;;  %v2503_v49 = vpop.xlane.xlu1 %663  ;;  %v881_v55 = vsel %vm3272_vm3, %v873_v2, %v2415_v0  ;;  %v838_v0 = vsel %vm2271_vm11, %v2171_v44, -inf  ;;  %v256_v37 = vadd.f32 %v238_v56, %v173_v36  ;;  %vm3276_vm3 = vcmask 56320  }
  0xb1   :  { %v2506_v3 = vpop.xlane.xlu0 %370  ;;  %v889_v62 = vsel %vm3275_vm4, %v881_v55, %v2389_v23  ;;  %v615_v36 = vsel %vm2266_vm10, %v2009_v60, -inf  ;;  %vm934_vm4 = vcmask 80896   ;;  %vm958_vm0 = vcmask 105472  }
  0xb2   :  { %264 = vst.msk [vmem:[#allocation2 + $0x8] sm:$0xff] %vm88_vm14, %v256_v37  ;;  %v897_v2 = vsel %vm3274_vm8, %v889_v62, %v2413_v15  ;;  %v654_v15 = vsel %vm2313_vm12, %v2064_v27, -inf  ;;  %v322_v37 = vsel %vm2318_vm13, %v1943_v32, -inf  ;;  %vm926_vm8 = vcmask 72704  }
  0xb3   :  { %v905_v55 = vsel %vm3273_vm9, %v897_v2, %v2441_v14  ;;  %v655_v14 = vsel %vm2318_vm13, %v2067_v28, -inf  ;;  %vm918_vm9 = vcmask 64512   ;;  %v634_v62 = vmax.f32 %v615_v36, %v616_v41 }
  0xb4   :  { %v1837_v41 = vmov 16  }
  0xb5   :  { %854 = vmax.xlane.f32.xlu2 %v853_v61  ;;  %820 = vmax.xlane.f32.xlu1 %v819_v4  ;;  %v856_v61 = vmax.f32 %v837_v38, %v838_v0  ;;  %v597_v4 = vmax.f32 %v578_v50, %v579_v57  ;;  %v913_v38 = vsel %vm3276_vm3, %v905_v55, %v2439_v25  ;;  %v321_v0 = vsel %vm2313_vm12, %v1941_v31, -inf }
  0xb6   :  { %561 = vmax.xlane.f32.xlu0 %v560_v33  ;;  %v202_v33 = vpop.f32.mrf.mxu0  ;;  %v674_v25 = vmax.f32 %v654_v15, %v655_v14  ;;  %vm3279_vm3 = vcmask 89088   ;;  %1679 = vset.pattern.permute.xlu1 %v1837_v41 }
  0xb7   :  { %v241_v23 = vadd.f32 %v240_v1, %v202_v33  ;;  %1677 = vset.pattern.permute.xlu0 %v1837_v41  ;;  %1678 = vset.pattern.permute.xlu2 %v1837_v41 }
  0xb8   :  { %v738_v21 = vpop.xlane.xlu2 %737  ;;  %v2533_v39 = vpop.xlane.xlu1 %444 }
  0xb9   :  { %v701_v56 = vpop.xlane.xlu0 %700  ;;  %v257_v34 = vadd.f32 %v241_v23, %v174_v35  ;;  %v175_v35 = vld [vmem:[#allocation2 + $0x18] sm:$0xff] }
  0xbb   :  { %265 = vst.msk [vmem:[#allocation2 + $0x10] sm:$0xff] %vm88_vm14, %v257_v34 }
  0xbd   :  { %305 = vmax.xlane.f32.xlu2 %v304_v6  ;;  %857 = vmax.xlane.f32.xlu1 %v856_v61  ;;  %v243_v6 = vpop.f32.mrf.mxu1  ;;  %v921_v61 = vsel %vm918_vm9, %v913_v38, %v2437_v24  ;;  %v652_v24 = vsel %vm2266_vm10, %v2064_v27, -inf  ;;  %vm3281_vm10 = vcmask 121856  }
  0xbe   :  { %598 = vmax.xlane.f32.xlu0 %v597_v4  ;;  %v341_v4 = vmax.f32 %v321_v0, %v322_v37  ;;  %v929_v2 = vsel %vm926_vm8, %v921_v61, %v2466_v5  ;;  %v205_v33 = vpop.f32.mrf.mxu0  ;;  %v653_v5 = vsel %vm2271_vm11, %v2067_v28, -inf  ;;  %vm3334_vm11 = vcmask 7168  }
  0xbf   :  { %v937_v55 = vsel %vm934_vm4, %v929_v2, %v2503_v49  ;;  %v244_v23 = vadd.f32 %v243_v6, %v205_v33  ;;  %v691_v49 = vsel %vm2313_vm12, %v2105_v53, -inf }
  0xc0   :  { %v2560_v50 = vpop.xlane.xlu2 %518  ;;  %v775_v57 = vpop.xlane.xlu1 %774  ;;  %v945_v34 = vsel %vm3279_vm3, %v937_v55, %v701_v56  ;;  %v692_v56 = vsel %vm2318_vm13, %v2108_v54, -inf  ;;  %vm3282_vm3 = vcmask 113664   ;;  %v729_v55 = vsel %vm2318_vm13, %v2102_v52, -inf }
  0xc1   :  { %v2563_v1 = vpop.xlane.xlu0 %481  ;;  %v258_v36 = vadd.f32 %v244_v23, %v175_v35  ;;  %v953_v15 = vsel %vm950_vm1, %v945_v34, %v738_v21  ;;  %v711_v6 = vmax.f32 %v691_v49, %v692_v56  ;;  %v395_v21 = vsel %vm2313_vm12, %v1937_v29, -inf }
  0xc2   :  { %v961_v0 = vsel %vm958_vm0, %v953_v15, %v775_v57  ;;  %v396_v57 = vsel %vm2318_vm13, %v1939_v30, -inf  ;;  %v728_v35 = vsel %vm2313_vm12, %v2099_v51, -inf  ;;  %v580_v23 = vsel %vm2313_vm12, %v1970_v43, -inf }
  0xc3   :  { %266 = vst.msk [vmem:[#allocation2 + $0x18] sm:$0xff] %vm88_vm14, %v258_v36  ;;  %v581_v34 = vsel %vm2318_vm13, %v1973_v45, -inf  ;;  %v415_v36 = vmax.f32 %v395_v21, %v396_v57  ;;  %v748_v41 = vmax.f32 %v728_v35, %v729_v55  ;;  %v433_v15 = vsel %vm2318_vm13, %v1895_v9, -inf }
  0xc4   :  { %v470_v57 = vsel %vm2318_vm13, %v1917_v18, -inf  ;;  %v839_v35 = vsel %vm2313_vm12, %v2168_v42, -inf  ;;  %v840_v55 = vsel %vm2318_vm13, %v2171_v44, -inf }
  0xc5   :  { %635 = vmax.xlane.f32.xlu2 %v634_v62  ;;  %675 = vmax.xlane.f32.xlu1 %v674_v25  ;;  %v984_v62 = vld [vmem:[#allocation3 + $0x10] sm:$0xff]  ;;  %v671_v25 = vmax.f32 %v652_v24, %v653_v5  ;;  %v246_v21 = vpop.f32.mrf.mxu1 }
  0xc6   :  { %342 = vmax.xlane.f32.xlu0 %v341_v4  ;;  %v378_v4 = vmax.f32 %v358_v16, %v359_v40  ;;  %v600_v16 = vmax.f32 %v580_v23, %v581_v34  ;;  %v432_v40 = vsel %vm2313_vm12, %v1893_v8, -inf }
  0xc8   :  { %v849_v14 = vpop.xlane.xlu2 %848  ;;  %v2591_v38 = vpop.xlane.xlu1 %555 }
  0xc9   :  { %v812_v37 = vpop.xlane.xlu0 %811 }
  0xca   :  { %v969_v61 = vsel %vm3282_vm3, %v961_v0, %v812_v37  ;;  %v766_v0 = vsel %vm2318_vm13, %v2138_v22, -inf  ;;  %vm3342_vm3 = vcmask 39936  }
  0xcb   :  { %v977_v2 = vsel %vm3281_vm10, %v969_v61, %v849_v14  ;;  %v765_v14 = vsel %vm2313_vm12, %v2135_v20, -inf }
  0xcc   :  { %v991_v33 = vmax.f32 %v984_v62, %v977_v2  ;;  %v785_v61 = vmax.f32 %v765_v14, %v766_v0  ;;  %v208_v2 = vpop.f32.mrf.mxu0  ;;  %v506_v0 = vsel %vm2313_vm12, %v1979_v48, -inf }
  0xcd   :  { %672 = vmax.xlane.f32.xlu2 %v671_v25  ;;  %712 = vmax.xlane.f32.xlu1 %v711_v6  ;;  %v452_v6 = vmax.f32 %v432_v40, %v433_v15  ;;  %v247_v23 = vadd.f32 %v246_v21, %v208_v2  ;;  %v859_v40 = vmax.f32 %v839_v35, %v840_v55  ;;  %v2656_v15 = vld [vmem:[#allocation2 + $0x18] sm:$0xff]  ;;  %v310_v21 = vsel %vm2004_vm2, %v1943_v32, -inf }
  0xce   :  { %999 = vst.msk [vmem:[#allocation3 + $0x10] sm:$0xff] %vm3280_vm15, %v991_v33  ;;  %379 = vmax.xlane.f32.xlu0 %v378_v4  ;;  %v469_v4 = vsel %vm2313_vm12, %v1915_v17, -inf  ;;  %v176_v33 = vld [vmem:[#allocation2 + $0x20] sm:$0xff]  ;;  %vm3336_vm15 = vcmask 15360   ;;  %vm1017_vm10 = vcmp.gt.f32.partialorder %v2656_v15, 0.0  ;;  %v1838_v55 = vmov 0  }
  0xcf   :  { %3335 = vst [vmem:[#allocation24_spill] sm:$0xff] %v2656_v15  ;;  %v644_v2 = vsel %vm2070_vm7, %v2064_v27, -inf }
  0xd0   :  { %v337_v24 = vpop.xlane.xlu2 %336  ;;  %v300_v5 = vpop.xlane.xlu1 %299 }
  0xd1   :  { %v2617_v49 = vsel %vm3334_vm11, %v300_v5, %v337_v24  ;;  %v2619_v56 = vpop.xlane.xlu0 %592  ;;  %v259_v5 = vadd.f32 %v247_v23, %v176_v33  ;;  %v309_v33 = vsel %vm2029_vm5, %v1941_v31, -inf  ;;  %v1178_v23 = vsel %vm1017_vm10, 1, %v1838_v55 }
  0xd2   :  { %v323_v22 = vmax.f32 %v309_v33, %v310_v21  ;;  %vm3344_vm10 = vcmask 56320  }
  0xd3   :  { %267 = vst.msk [vmem:[#allocation2 + $0x20] sm:$0xff] %vm88_vm14, %v259_v5 }
  0xd5   :  { %416 = vmax.xlane.f32.xlu2 %v415_v36  ;;  %749 = vmax.xlane.f32.xlu1 %v748_v41  ;;  %v866_v36 = vsel %vm3334_vm11, %v2471_v26, %v2468_v19  ;;  %v211_v19 = vpop.f32.mrf.mxu0  ;;  %v177_v26 = vld [vmem:[#allocation2 + $0x28] sm:$0xff]  ;;  %vm3341_vm11 = vcmask 31744  }
  0xd6   :  { %601 = vmax.xlane.f32.xlu0 %v600_v16  ;;  %v489_v16 = vmax.f32 %v469_v4, %v470_v57  ;;  %v874_v14 = vsel %vm3336_vm15, %v866_v36, %v2506_v3  ;;  %vm3340_vm15 = vcmask 23552   ;;  %v645_v3 = vsel %vm2050_vm6, %v2067_v28, -inf }
  0xd7   :  { %v882_v35 = vsel %vm3340_vm15, %v874_v14, %v2501_v7  ;;  %vm3343_vm15 = vcmask 48128  }
  0xd8   :  { %v2633_v37 = vpop.xlane.xlu2 %666  ;;  %v2635_v62 = vpop.xlane.xlu1 %373  ;;  %v890_v5 = vsel %vm3341_vm11, %v882_v35, %v2533_v39  ;;  %v2688_v39 = vld [vmem:[#allocation2] sm:$0xff]  ;;  %vm3348_vm11 = vcmask 113664  }
  0xd9   :  { %v630_v25 = vpop.xlane.xlu0 %629  ;;  %v898_v15 = vsel %vm3342_vm3, %v890_v5, %v2563_v1  ;;  %v543_v1 = vsel %vm2313_vm12, %v1975_v46, -inf  ;;  %vm3346_vm3 = vcmask 89088  }
  0xda   :  { %v906_v7 = vsel %vm3343_vm15, %v898_v15, %v2560_v50  ;;  %v421_v50 = vsel %vm2004_vm2, %v1895_v9, -inf  ;;  %vm3349_vm15 = vcmask 121856  }
  0xdb   :  { %v914_v14 = vsel %vm3344_vm10, %v906_v7, %v2591_v38  ;;  %vm3350_vm10 = vcmask 130048  }
  0xdd   :  { %453 = vmax.xlane.f32.xlu2 %v452_v6  ;;  %786 = vmax.xlane.f32.xlu1 %v785_v61  ;;  %v249_v6 = vpop.f32.mrf.mxu1  ;;  %v3337_v61 = vld [vmem:[#allocation14_spill] sm:$0xff] }
  0xde   :  { %v507_v4 = vsel %vm2318_vm13, %v3337_v61, -inf  ;;  %v250_v57 = vadd.f32 %v249_v6, %v211_v19  ;;  %3345 = vst [vmem:[#allocation14_spill] sm:$0xff] %v2688_v39  ;;  %v420_v19 = vsel %vm2029_vm5, %v1893_v8, -inf }
  0xdf   :  { %v526_v42 = vmax.f32 %v506_v0, %v507_v4  ;;  %v544_v0 = vsel %vm2318_vm13, %v1977_v47, -inf  ;;  %v434_v33 = vmax.f32 %v420_v19, %v421_v50 }
  0xe0   :  { %v2649_v34 = vpop.xlane.xlu2 %447  ;;  %v704_v24 = vpop.xlane.xlu1 %703  ;;  %v563_v4 = vmax.f32 %v543_v1, %v544_v0  ;;  %v618_v1 = vsel %vm2318_vm13, %v2015_v63, -inf  ;;  %v985_v0 = vld [vmem:[#allocation3 + $0x18] sm:$0xff] }
  0xe1   :  { %v2654_v41 = vpop.xlane.xlu0 %410 }
  0xe5   :  { %490 = vmax.xlane.f32.xlu2 %v489_v16  ;;  %860 = vmax.xlane.f32.xlu1 %v859_v40  ;;  %v260_v40 = vadd.f32 %v250_v57, %v177_v26  ;;  %v1021_v26 = vmax.f32 %v2688_v39, 1.0  ;;  %v214_v21 = vpop.f32.mrf.mxu0  ;;  %v178_v57 = vld [vmem:[#allocation2 + $0x30] sm:$0xff]  ;;  %v252_v35 = vpop.f32.mrf.mxu1 }
  0xe6   :  { %v253_v5 = vadd.f32 %v252_v35, %v214_v21 }
  0xe7   :  { %268 = vst.msk [vmem:[#allocation2 + $0x28] sm:$0xff] %vm88_vm14, %v260_v40  ;;  %v2714_v40 = vld [vmem:[#allocation2 + $0x8] sm:$0xff] }
  0xe8   :  { %v778_v36 = vpop.xlane.xlu2 %777  ;;  %v2679_v16 = vpop.xlane.xlu1 %484  ;;  %3347 = vst [vmem:[#allocation16_spill] sm:$0xff] %v2714_v40  ;;  %v261_v7 = vadd.f32 %v253_v5, %v178_v57  ;;  %v1022_v19 = vmax.f32 %v2714_v40, 1.0 }
  0xe9   :  { %v741_v44 = vpop.xlane.xlu0 %740 }
  0xea   :  { %1192 = vperm.xlu0 %1677, %v1178_v23   ;;  %269 = vst.msk [vmem:[#allocation2 + $0x30] sm:$0xff] %vm88_vm14, %v261_v7 }
  0xed   :  { %527 = vmax.xlane.f32.xlu2 %v526_v42  ;;  %324 = vmax.xlane.f32.xlu1 %v323_v22  ;;  %v922_v22 = vsel %vm918_vm9, %v914_v14, %v2619_v56  ;;  %v617_v14 = vsel %vm2313_vm12, %v2009_v60, -inf }
  0xee   :  { %v930_v42 = vsel %vm926_vm8, %v922_v22, %v630_v25  ;;  %v2743_v7 = vld [vmem:[#allocation2 + $0x28] sm:$0xff] }
  0xef   :  { %v938_v23 = vsel %vm934_vm4, %v930_v42, %v2633_v37  ;;  %v637_v42 = vmax.f32 %v617_v14, %v618_v1 }
  0xf0   :  { %v2705_v38 = vpop.xlane.xlu2 %558  ;;  %v815_v15 = vpop.xlane.xlu1 %814  ;;  %v946_v56 = vsel %vm3346_vm3, %v938_v23, %v704_v24 }
  0xf1   :  { %v2708_v6 = vpop.xlane.xlu0 %521  ;;  %v954_v25 = vsel %vm950_vm1, %v946_v56, %v741_v44  ;;  %v2740_v56 = vld [vmem:[#allocation2 + $0x20] sm:$0xff] }
  0xf2   :  { %1030 = vperm.xlu0 %1677, %v1021_v26   ;;  %v962_v37 = vsel %vm958_vm0, %v954_v25, %v778_v36  ;;  %vm1018_vm3 = vcmp.gt.f32.partialorder %v2740_v56, 0.0 }
  0xf3   :  { %v970_v50 = vsel %vm3348_vm11, %v962_v37, %v815_v15  ;;  %vm1019_vm11 = vcmp.gt.f32.partialorder %v2743_v7, 0.0 }
  0xf5   :  { %564 = vmax.xlane.f32.xlu2 %v563_v4  ;;  %435 = vmax.xlane.f32.xlu1 %v434_v33  ;;  %v2730_v33 = vld [vmem:[#allocation2 + $0x10] sm:$0xff] }
  0xf6   :  { %3351 = vst [vmem:[#allocation15_spill] sm:$0xff] %v2730_v33  ;;  %v1023_v57 = vmax.f32 %v2730_v33, 1.0  ;;  %vm1016_vm14 = vcmp.gt.f32.partialorder %v2730_v33, 0.0 }
  0xf7   :  { %v1177_v25 = vsel %vm1016_vm14, 1, %v1838_v55 }
  0xf8   :  { %v2724_v24 = vpop.xlane.xlu2 %302  ;;  %v596_v44 = vpop.xlane.xlu1 %595 }
  0xf9   :  { %v852_v22 = vpop.xlane.xlu0 %851 }
  0xfa   :  { %v978_v26 = vsel %vm3349_vm15, %v970_v50, %v852_v22  ;;  %1035 = vperm.xlu0 %1677, %v1022_v19   ;;  %v1180_v19 = vsel %vm1019_vm11, 1, %v1838_v55  ;;  %v2753_v50 = vld [vmem:[#allocation2 + $0x30] sm:$0xff]  ;;  %vm3352_vm15 = vcmask 15360   ;;  %vm3355_vm11 = vcmask 39936  }
  0xfb   :  { %v992_v4 = vmax.f32 %v985_v0, %v978_v26  ;;  %v1179_v0 = vsel %vm1018_vm3, 1, %v1838_v55  ;;  %v875_v22 = vsel %vm3352_vm15, %v2617_v49, %v2635_v62  ;;  %vm1020_vm14 = vcmp.gt.f32.partialorder %v2753_v50, 0.0 }
  0xfc   :  { %vm3354_vm3 = vcmask 31744   ;;  %v1181_v33 = vsel %vm1020_vm14, 1, %v1838_v55  ;;  %vm3356_vm15 = vcmask 48128   ;;  %vm3359_vm14 = vcmask 113664  }
  0xfd   :  { %1000 = vst.msk [vmem:[#allocation3 + $0x18] sm:$0xff] %vm3350_vm10, %v992_v4  ;;  %638 = vmax.xlane.f32.xlu2 %v637_v42  ;;  %vm3353_vm10 = vcmask 23552  }
  0xfe   :  { %v883_v42 = vsel %vm3353_vm10, %v875_v22, %v2654_v41  ;;  %vm3357_vm10 = vcmask 56320  }
 0x100   :  { %v2732_v36 = vpop.xlane.xlu2 %376  ;;  %v633_v21 = vpop.xlane.xlu1 %632 }
 0x101   :  { %v2735_v35 = vpop.xlane.xlu0 %339 }
 0x102   :  { %1040 = vperm.xlu0 %1677, %v1023_v57  }
 0x108   :  { %v2737_v15 = vpop.xlane.xlu2 %413  ;;  %v818_v23 = vpop.xlane.xlu1 %817 }
 0x109   :  { %v670_v5 = vpop.xlane.xlu0 %669 }
 0x10e   :  { %1189 = vperm.xlu1 %1679, %v1177_v25   ;;  %v891_v25 = vsel %vm3354_vm3, %v883_v42, %v2649_v34  ;;  %vm3358_vm3 = vcmask 89088  }
 0x110   :  { %v2746_v14 = vpop.xlane.xlu2 %450  ;;  %v2749_v1 = vpop.xlane.xlu1 %709 }
 0x111   :  { %v707_v37 = vpop.xlane.xlu0 %706 }
 0x115   :  { %1195 = vperm.xlu2 %1678, %v1179_v0   ;;  %v899_v0 = vsel %vm3355_vm11, %v891_v25, %v2679_v16  ;;  %v1025_v25 = vmax.f32 %v2740_v56, 1.0  ;;  %vm3360_vm11 = vcmask 121856  }
 0x116   :  { %1198 = vperm.xlu1 %1679, %v1180_v19   ;;  %v907_v49 = vsel %vm3356_vm15, %v899_v0, %v2708_v6  ;;  %vm3361_vm15 = vcmask 130048  }
 0x117   :  { %v915_v62 = vsel %vm3357_vm10, %v907_v49, %v2705_v38  ;;  %v272_v38 = vsel %vm2029_vm5, %v1901_v12, -inf  ;;  %vm3362_vm10 = vcmask 7168  }
 0x118   :  { %v488_v26 = vpop.xlane.xlu2 %487  ;;  %v2761_v4 = vpop.xlane.xlu1 %746  ;;  %v923_v41 = vsel %vm918_vm9, %v915_v62, %v596_v44  ;;  %v273_v44 = vsel %vm2004_vm2, %v1903_v13, -inf  ;;  %v383_v62 = vsel %vm2029_vm5, %v1937_v29, -inf }
 0x119   :  { %v744_v57 = vpop.xlane.xlu0 %743  ;;  %v931_v39 = vsel %vm926_vm8, %v923_v41, %v633_v21  ;;  %v384_v41 = vsel %vm2004_vm2, %v1939_v30, -inf }
 0x11a   :  { %v939_v34 = vsel %vm934_vm4, %v931_v39, %v670_v5  ;;  %v286_v5 = vmax.f32 %v272_v38, %v273_v44  ;;  %v868_v38 = vsel %vm3362_vm10, %v2724_v24, %v2735_v35  ;;  %v3363_v44 = vld [vmem:[#allocation22_spill] sm:$0xff]  ;;  %vm3371_vm10 = vcmask 89088  }
 0x11b   :  { %v947_v16 = vsel %vm3358_vm3, %v939_v34, %v707_v37  ;;  %v397_v34 = vmax.f32 %v383_v62, %v384_v41  ;;  %vm3365_vm3 = vcmask 15360  }
 0x11c   :  { %v955_v42 = vsel %vm950_vm1, %v947_v16, %v744_v57 }
 0x11e   :  { %1201 = vperm.xlu1 %1679, %v1181_v33   ;;  %v986_v33 = vld [vmem:[#allocation3 + $0x20] sm:$0xff] }
 0x120   :  { %v525_v19 = vpop.xlane.xlu2 %524  ;;  %v784_v22 = vpop.xlane.xlu1 %783 }
 0x121   :  { %v781_v40 = vpop.xlane.xlu0 %780 }
 0x122   :  { %v963_v6 = vsel %vm958_vm0, %v955_v42, %v781_v40  ;;  %v1026_v40 = vmax.f32 %v2743_v7, 1.0 }
 0x123   :  { %v971_v39 = vsel %vm3359_vm14, %v963_v6, %v818_v23  ;;  %v458_v6 = vsel %vm2004_vm2, %v1917_v18, -inf  ;;  %vm3366_vm14 = vcmask 23552  }
 0x126   :  { %1050 = vperm.xlu1 %1679, %v1025_v25   ;;  %v457_v25 = vsel %vm2029_vm5, %v1915_v17, -inf }
 0x128   :  { %v855_v21 = vpop.xlane.xlu2 %854  ;;  %v821_v37 = vpop.xlane.xlu1 %820 }
 0x129   :  { %v979_v57 = vsel %vm3360_vm11, %v971_v39, %v855_v21  ;;  %v562_v0 = vpop.xlane.xlu0 %561  ;;  %v3364_v21 = vld [vmem:[#allocation23_spill] sm:$0xff]  ;;  %vm3367_vm11 = vcmask 31744  }
 0x12a   :  { %v993_v49 = vmax.f32 %v986_v33, %v979_v57  ;;  %v802_v33 = vsel %vm2313_vm12, %v3363_v44, -inf  ;;  %v803_v39 = vsel %vm2318_vm13, %v3364_v21, -inf  ;;  %v471_v57 = vmax.f32 %v457_v25, %v458_v6 }
 0x12b   :  { %v822_v62 = vmax.f32 %v802_v33, %v803_v39  ;;  %vm3368_vm12 = vcmask 39936   ;;  %vm3370_vm13 = vcmask 56320  }
 0x12c   :  { %1001 = vst.msk [vmem:[#allocation3 + $0x20] sm:$0xff] %vm3361_vm15, %v993_v49  ;;  %287 = vmax.xlane.f32.xlu0 %v286_v5  ;;  %v876_v49 = vsel %vm3365_vm3, %v868_v38, %v2732_v36  ;;  %vm3369_vm15 = vcmask 48128   ;;  %v495_v36 = vsel %vm2004_vm2, %v3337_v61, -inf  ;;  %vm3372_vm3 = vcmask 113664  }
 0x12e   :  { %1055 = vperm.xlu1 %1679, %v1026_v40   ;;  %v884_v40 = vsel %vm3366_vm14, %v876_v49, %v2737_v15  ;;  %v987_v49 = vld [vmem:[#allocation3 + $0x28] sm:$0xff]  ;;  %vm3373_vm14 = vcmask 121856  }
 0x12f   :  { %v892_v24 = vsel %vm3367_vm11, %v884_v40, %v2746_v14  ;;  %v346_v14 = vsel %vm2029_vm5, %v1897_v10, -inf  ;;  %vm3374_vm11 = vcmask 7168  }
 0x130   :  { %v306_v23 = vpop.xlane.xlu2 %305  ;;  %v858_v16 = vpop.xlane.xlu1 %857  ;;  %v900_v35 = vsel %vm3368_vm12, %v892_v24, %v488_v26  ;;  %v347_v26 = vsel %vm2004_vm2, %v1899_v11, -inf  ;;  %v568_v24 = vsel %vm2029_vm5, %v1970_v43, -inf  ;;  %vm3375_vm12 = vcmask 15360  }
 0x131   :  { %v599_v42 = vpop.xlane.xlu0 %598  ;;  %v908_v59 = vsel %vm3369_vm15, %v900_v35, %v525_v19  ;;  %v360_v39 = vmax.f32 %v346_v14, %v347_v26  ;;  %vm3376_vm15 = vcmask 130048   ;;  %v312_v26 = vsel %vm2050_vm6, %v1943_v32, -inf }
 0x132   :  { %v916_v15 = vsel %vm3370_vm13, %v908_v59, %v562_v0  ;;  %v531_v59 = vsel %vm2029_vm5, %v1975_v46, -inf  ;;  %vm3377_vm13 = vcmask 23552   ;;  %v349_v32 = vsel %vm2050_vm6, %v1899_v11, -inf }
 0x133   :  { %v924_v25 = vsel %vm918_vm9, %v916_v15, %v599_v42  ;;  %v606_v11 = vsel %vm2004_vm2, %v2015_v63, -inf }
 0x134   :  { %398 = vmax.xlane.f32.xlu0 %v397_v34  ;;  %v494_v34 = vsel %vm2029_vm5, %v1979_v48, -inf }
 0x135   :  { %v508_v38 = vmax.f32 %v494_v34, %v495_v36 }
 0x138   :  { %v636_v5 = vpop.xlane.xlu2 %635  ;;  %v2814_v41 = vpop.xlane.xlu1 %675 }
 0x139   :  { %v343_v58 = vpop.xlane.xlu0 %342  ;;  %v932_v19 = vsel %vm926_vm8, %v924_v25, %v636_v5 }
 0x13c   :  { %472 = vmax.xlane.f32.xlu0 %v471_v57 }
 0x13e   :  { %823 = vmax.xlane.f32.xlu2 %v822_v62 }
 0x140   :  { %v673_v6 = vpop.xlane.xlu2 %672  ;;  %v2841_v40 = vpop.xlane.xlu1 %712 }
 0x141   :  { %v940_v33 = vsel %vm934_vm4, %v932_v19, %v673_v6  ;;  %v380_v5 = vpop.xlane.xlu0 %379  ;;  %v274_v6 = vsel %vm2070_vm7, %v1901_v12, -inf  ;;  %v642_v12 = vsel %vm2029_vm5, %v2064_v27, -inf  ;;  %v718_v27 = vsel %vm2070_vm7, %v2099_v51, -inf }
 0x142   :  { %v948_v0 = vsel %vm3371_vm10, %v940_v33, %v2749_v1  ;;  %v569_v1 = vsel %vm2004_vm2, %v1973_v45, -inf  ;;  %vm3380_vm10 = vcmask 31744  }
 0x143   :  { %v956_v42 = vsel %vm950_vm1, %v948_v0, %v2761_v4  ;;  %v869_v4 = vsel %vm3374_vm11, %v306_v23, %v343_v58  ;;  %v582_v15 = vmax.f32 %v568_v24, %v569_v1  ;;  %v311_v58 = vsel %vm2070_vm7, %v1941_v31, -inf }
 0x144   :  { %v964_v57 = vsel %vm958_vm0, %v956_v42, %v784_v22  ;;  %509 = vmax.xlane.f32.xlu0 %v508_v38  ;;  %v877_v34 = vsel %vm3375_vm12, %v869_v4, %v380_v5  ;;  %v275_v38 = vsel %vm2050_vm6, %v1903_v13, -inf  ;;  %v326_v0 = vmax.f32 %v311_v58, %v312_v26  ;;  %v1217_v58 = vld [vmem:[#allocation8] sm:$0xff] }
 0x145   :  { %v972_v62 = vsel %vm3372_vm3, %v964_v57, %v821_v37  ;;  %v532_v37 = vsel %vm2004_vm2, %v1977_v47, -inf  ;;  %v348_v31 = vsel %vm2070_vm7, %v1897_v10, -inf  ;;  %v643_v13 = vsel %vm2004_vm2, %v2067_v28, -inf }
 0x146   :  { %v980_v35 = vsel %vm3373_vm14, %v972_v62, %v858_v16  ;;  %361 = vmax.xlane.f32.xlu2 %v360_v39  ;;  %v545_v25 = vmax.f32 %v531_v59, %v532_v37  ;;  %v289_v39 = vmax.f32 %v274_v6, %v275_v38  ;;  %v363_v42 = vmax.f32 %v348_v31, %v349_v32 }
 0x147   :  { %v994_v22 = vmax.f32 %v987_v49, %v980_v35  ;;  %v605_v10 = vsel %vm2029_vm5, %v2009_v60, -inf  ;;  %v656_v49 = vmax.f32 %v642_v12, %v643_v13  ;;  %v533_v5 = vsel %vm2070_vm7, %v1975_v46, -inf }
 0x148   :  { %v417_v36 = vpop.xlane.xlu2 %416  ;;  %v2867_v19 = vpop.xlane.xlu1 %749  ;;  %v534_v24 = vsel %vm2050_vm6, %v1977_v47, -inf  ;;  %v619_v1 = vmax.f32 %v605_v10, %v606_v11  ;;  %v679_v4 = vsel %vm2029_vm5, %v2105_v53, -inf  ;;  %v385_v46 = vsel %vm2070_vm7, %v1937_v29, -inf  ;;  %v3384_v11 = vld [vmem:[#allocation19_spill] sm:$0xff] }
 0x149   :  { %1002 = vst.msk [vmem:[#allocation3 + $0x28] sm:$0xff] %vm3376_vm15, %v994_v22  ;;  %v885_v16 = vsel %vm3377_vm13, %v877_v34, %v417_v36  ;;  %v548_v35 = vmax.f32 %v533_v5, %v534_v24  ;;  %v680_v22 = vsel %vm2004_vm2, %v2108_v54, -inf  ;;  %v386_v47 = vsel %vm2050_vm6, %v1939_v30, -inf  ;;  %v1218_v34 = vld [vmem:[#allocation8 + $0x8] sm:$0xff] }
 0x14a   :  { %v693_v37 = vmax.f32 %v679_v4, %v680_v22  ;;  %v570_v36 = vsel %vm2070_vm7, %v1970_v43, -inf  ;;  %1658 = vmatpush.msra.mxu2 %v1218_v34  ;;  %1279 = vmatpush.msrb.mxu1 %v1218_v34  ;;  %v716_v26 = vsel %vm2029_vm5, %v2099_v51, -inf  ;;  %v717_v43 = vsel %vm2004_vm2, %v2102_v52, -inf }
 0x14b   :  { %v423_v6 = vsel %vm2050_vm6, %v1895_v9, -inf  ;;  %v681_v31 = vsel %vm2070_vm7, %v2105_v53, -inf  ;;  %v682_v32 = vsel %vm2050_vm6, %v2108_v54, -inf  ;;  %vm3381_vm3 = vcmask 39936  }
 0x14c   :  { %583 = vmax.xlane.f32.xlu0 %v582_v15  ;;  %v571_v15 = vsel %vm2050_vm6, %v1973_v45, -inf  ;;  %1659 = vmatpush.msra.mxu2 %v1217_v58  ;;  %v422_v45 = vsel %vm2070_vm7, %v1893_v8, -inf  ;;  %vm3382_vm14 = vcmask 48128   ;;  %v696_v13 = vmax.f32 %v681_v31, %v682_v32  ;;  %v1171_v31 = vld [vmem:[#allocation3 + $0x18] sm:$0xff] }
 0x14d   :  { %1280 = vmatpush.msrb.mxu1 %v1217_v58  ;;  %v585_v30 = vmax.f32 %v570_v36, %v571_v15  ;;  %vm3383_vm11 = vcmask 56320   ;;  %v753_v53 = vsel %vm2029_vm5, %v2135_v20, -inf  ;;  %v754_v54 = vsel %vm2004_vm2, %v3384_v11, -inf  ;;  %v3386_v36 = vld [vmem:[#allocation20_spill] sm:$0xff]  ;;  %v3387_v15 = vld [vmem:[#allocation21_spill] sm:$0xff] }
 0x14e   :  { %546 = vmax.xlane.f32.xlu2 %v545_v25  ;;  %v400_v25 = vmax.f32 %v385_v46, %v386_v47  ;;  %v767_v24 = vmax.f32 %v753_v53, %v754_v54  ;;  %v756_v4 = vsel %vm2050_vm6, %v3384_v11, -inf  ;;  %vm3385_vm12 = vcmask 89088  }
 0x14f   :  { %vm3388_vm13 = vcmask 130048   ;;  %v1027_v54 = vmax.f32 %v2753_v50, 1.0  ;;  %v719_v28 = vsel %vm2050_vm6, %v2102_v52, -inf  ;;  %v792_v51 = vsel %vm2070_vm7, %v3363_v44, -inf }
 0x150   :  { %v454_v33 = vpop.xlane.xlu2 %453  ;;  %v2893_v62 = vpop.xlane.xlu1 %786  ;;  %v793_v52 = vsel %vm2050_vm6, %v3364_v21, -inf }
 0x154   :  { %327 = vmax.xlane.f32.xlu0 %v326_v0  ;;  %v730_v0 = vmax.f32 %v716_v26, %v717_v43  ;;  %v1170_v26 = vld [vmem:[#allocation3 + $0x10] sm:$0xff] }
 0x156   :  { %290 = vmax.xlane.f32.xlu2 %v289_v39  ;;  %v893_v39 = vsel %vm3380_vm10, %v885_v16, %v454_v33  ;;  %v602_v16 = vpop.xlane.xlu0 %601  ;;  %v459_v33 = vsel %vm2070_vm7, %v1915_v17, -inf }
 0x158   :  { %v491_v57 = vpop.xlane.xlu2 %490  ;;  %364 = vmax.xlane.f32.xlu1 %v363_v42  ;;  %v2919_v29 = vpop.xlane.xlu1 %860  ;;  %v437_v42 = vmax.f32 %v422_v45, %v423_v6  ;;  %v827_v6 = vsel %vm2029_vm5, %v3386_v36, -inf }
 0x159   :  { %v901_v8 = vsel %vm3381_vm3, %v893_v39, %v491_v57  ;;  %v460_v57 = vsel %vm2050_vm6, %v1917_v18, -inf  ;;  %vm3389_vm3 = vmmov %vm3388_vm13 }
 0x15a   :  { %v474_v22 = vmax.f32 %v459_v33, %v460_v57 }
 0x15c   :  { %657 = vmax.xlane.f32.xlu0 %v656_v49 }
 0x15e   :  { %620 = vmax.xlane.f32.xlu2 %v619_v1  ;;  %v1193_v34 = vpop.permute.xlu0 %1192 }
 0x15f   :  { %vm1206_vm10 = vcmp.eq.s32.totalorder %v1193_v34, 1  ;;  %v3397_v34 = vld [vmem:[#allocation14_spill] sm:$0xff] }
 0x160   :  { %v528_v59 = vpop.xlane.xlu2 %527  ;;  %549 = vmax.xlane.f32.xlu1 %v548_v35  ;;  %v2942_v9 = vpop.xlane.xlu1 %324  ;;  %v755_v35 = vsel %vm2070_vm7, %v2135_v20, -inf  ;;  %v496_v20 = vsel %vm2070_vm7, %v1979_v48, -inf  ;;  %v830_v48 = vsel %vm2050_vm6, %v3387_v15, -inf  ;;  %v1213_v32 = vsel %vm1206_vm10, %v1171_v31, 0.0 }
 0x161   :  { %v909_v12 = vsel %vm3382_vm14, %v901_v8, %v528_v59  ;;  %v770_v46 = vmax.f32 %v755_v35, %v756_v4  ;;  %v497_v59 = vsel %vm2050_vm6, %v3337_v61, -inf  ;;  %v807_v4 = vmax.f32 %v792_v51, %v793_v52 }
 0x162   :  { %vm3396_vm10 = vcmask 121856  }
 0x164   :  { %694 = vmax.xlane.f32.xlu0 %v693_v37 }
 0x166   :  { %401 = vmax.xlane.f32.xlu2 %v400_v25  ;;  %v791_v25 = vsel %vm2004_vm2, %v3364_v21, -inf  ;;  %v2995_v45 = vpop.permute.xlu0 %1030 }
 0x167   :  { %1682 = vrcp.f32 %v2995_v45  ;;  %v1072_v14 = vand.u32 2147483647, %v2995_v45 }
 0x168   :  { %v565_v38 = vpop.xlane.xlu2 %564  ;;  %586 = vmax.xlane.f32.xlu1 %v585_v30  ;;  %v2981_v37 = vpop.xlane.xlu1 %435 }
 0x169   :  { %v917_v10 = vsel %vm3383_vm11, %v909_v12, %v565_v38  ;;  %v828_v38 = vsel %vm2004_vm2, %v3387_v15, -inf }
 0x16a   :  { %v925_v5 = vsel %vm918_vm9, %v917_v10, %v602_v16  ;;  %v1172_v10 = vld [vmem:[#allocation3 + $0x20] sm:$0xff]  ;;  %v3392_v16 = vld [vmem:[#allocation16_spill] sm:$0xff] }
 0x16b   :  { %vm1015_vm14 = vcmp.gt.f32.partialorder %v3392_v16, 0.0 }
 0x16c   :  { %731 = vmax.xlane.f32.xlu0 %v730_v0  ;;  %v841_v0 = vmax.f32 %v827_v6, %v828_v38  ;;  %v1176_v57 = vsel %vm1015_vm14, 1, %v1838_v55  ;;  %v1074_v6 = vand.u32 2147483648, %v2995_v45 }
 0x16e   :  { %438 = vmax.xlane.f32.xlu2 %v437_v42  ;;  %v3390_v42 = vld [vmem:[#allocation24_spill] sm:$0xff]  ;;  %v3006_v12 = vpop.permute.xlu0 %1035 }
 0x16f   :  { %v1024_v8 = vmax.f32 %v3390_v42, 1.0  ;;  %1684 = vrcp.f32 %v3006_v12 }
 0x170   :  { %v639_v49 = vpop.xlane.xlu2 %638  ;;  %697 = vmax.xlane.f32.xlu1 %v696_v13  ;;  %v659_v13 = vmax.f32 %v644_v2, %v645_v3 }
 0x171   :  { %v933_v1 = vsel %vm926_vm8, %v925_v5, %v639_v49  ;;  %v733_v49 = vmax.f32 %v718_v27, %v719_v28  ;;  %v1173_v5 = vld [vmem:[#allocation3 + $0x28] sm:$0xff] }
 0x172   :  { %v941_v17 = vsel %vm934_vm4, %v933_v1, %v2814_v41 }
 0x173   :  { %v949_v18 = vsel %vm3385_vm12, %v941_v17, %v2841_v40  ;;  %v511_v40 = vmax.f32 %v496_v20, %v497_v59  ;;  %vm3393_vm12 = vmmov %vm3389_vm3 }
 0x174   :  { %768 = vmax.xlane.f32.xlu0 %v767_v24  ;;  %v957_v47 = vsel %vm950_vm1, %v949_v18, %v2867_v19  ;;  %v829_v19 = vsel %vm2070_vm7, %v3386_v36, -inf }
 0x175   :  { %v2979_v41 = vsel %vm958_vm0, %v957_v47, %v2893_v62  ;;  %v844_v61 = vmax.f32 %v829_v19, %v830_v48  ;;  %v790_v62 = vsel %vm2029_vm5, %v3363_v44, -inf  ;;  %vm3391_vm5 = vmmov %vm3389_vm3  ;;  %v988_v44 = vld [vmem:[#allocation3 + $0x30] sm:$0xff] }
 0x176   :  { %475 = vmax.xlane.f32.xlu2 %v474_v22  ;;  %v804_v30 = vmax.f32 %v790_v62, %v791_v25  ;;  %v3023_v33 = vpop.permute.xlu0 %1040  ;;  %v1683_v22 = vpop.eup %1682 }
 0x177   :  { %v1064_v18 = vmul.f32 %v1683_v22, %v2995_v45  ;;  %v1685_v59 = vpop.eup %1684  ;;  %1686 = vrcp.f32 %v3023_v33  ;;  %vm1069_vm14 = vweird.f32 %v1683_v22  ;;  %v1104_v52 = vand.u32 2147483648, %v3023_v33 }
 0x178   :  { %771 = vmax.xlane.f32.xlu1 %v770_v46  ;;  %v1196_v39 = vpop.permute.xlu2 %1195  ;;  %v1079_v19 = vmul.f32 %v1685_v59, %v3006_v12 }
 0x179   :  { %vm1207_vm2 = vcmp.eq.s32.totalorder %v1196_v39, 1  ;;  %v1065_v20 = vsub.f32 1.0, %v1064_v18  ;;  %v1075_v39 = vor.u32 1.1754944e-38, %v1074_v6 }
 0x17a   :  { %v1214_v53 = vsel %vm1207_vm2, %v1172_v10, 0.0  ;;  %vm3398_vm2 = vmmov %vm3391_vm5 }
 0x17b   :  { %v1066_v36 = vmul.f32 %v1683_v22, %v1065_v20 }
 0x17c   :  { %512 = vmax.xlane.f32.xlu0 %v511_v40 }
 0x180   :  { %845 = vmax.xlane.f32.xlu1 %v844_v61  ;;  %v1190_v58 = vpop.permute.xlu1 %1189 }
 0x181   :  { %vm1205_vm15 = vcmp.eq.s32.totalorder %v1190_v58, 1  ;;  %v1080_v58 = vsub.f32 1.0, %v1079_v19 }
 0x182   :  { %v1212_v43 = vsel %vm1205_vm15, %v1170_v26, 0.0  ;;  %vm3394_vm15 = vcmask 7168  }
 0x183   :  { %1632 = vmatmul.msk.f32.vlgmr.msra.gmra.mxu2 %vm3388_vm13, %v1212_v43  ;;  %vm3395_vm13 = vcmask 113664   ;;  %v1067_v43 = vadd.f32 %v1683_v22, %v1066_v36 }
 0x184   :  { %805 = vmax.xlane.f32.xlu0 %v804_v30 }
 0x188   :  { %v1199_v11 = vpop.permute.xlu1 %1198 }
 0x189   :  { %vm1208_vm11 = vcmp.eq.s32.totalorder %v1199_v11, 1  ;;  %v1087_v11 = vand.u32 2147483647, %v3006_v12 }
 0x18a   :  { %v1215_v24 = vsel %vm1208_vm11, %v1173_v5, 0.0  ;;  %vm3400_vm11 = vcmask 23552  }
 0x18b   :  { %1633 = vmatmul.msk.f32.gmra.mxu2 %vm3389_vm3, %v1213_v32  ;;  %vm1014_vm3 = vcmp.gt.f32.partialorder %v3397_v34, 0.0 }
 0x18c   :  { %842 = vmax.xlane.f32.xlu0 %v841_v0  ;;  %v1175_v48 = vsel %vm1014_vm3, 1, %v1838_v55  ;;  %v1687_v55 = vpop.eup %1686  ;;  %v1081_v0 = vmul.f32 %v1685_v59, %v1080_v58  ;;  %vm1073_vm3 = vcmp.eq.f32.partialorder %v1072_v14, 8.507059e+37 }
 0x18d   :  { %v1094_v31 = vmul.f32 %v1687_v55, %v3023_v33 }
 0x18e   :  { %1045 = vperm.xlu2 %1678, %v1024_v8  }
 0x18f   :  { %v1095_v3 = vsub.f32 1.0, %v1094_v31 }
 0x190   :  { %v1202_v62 = vpop.permute.xlu1 %1201 }
 0x193   :  { %1634 = vmatmul.msk.f32.gmra.mxu2 %vm3391_vm5, %v1214_v53  ;;  %vm3399_vm5 = vcmask 15360  }
 0x194   :  { %660 = vmax.xlane.f32.xlu0 %v659_v13  ;;  %v1082_v13 = vadd.f32 %v1685_v59, %v1081_v0 }
 0x196   :  { %1060 = vperm.xlu2 %1678, %v1027_v54   ;;  %v1096_v54 = vmul.f32 %v1687_v55, %v1095_v3 }
 0x198   :  { %v3072_v10 = vpop.permute.xlu1 %1050  ;;  %v1097_v51 = vadd.f32 %v1687_v55, %v1096_v54  ;;  %v982_v54 = vld [vmem:[#allocation3] sm:$0xff] }
 0x199   :  { %1186 = vperm.xlu1 %1679, %v1176_v57   ;;  %1688 = vrcp.f32 %v3072_v10 }
 0x19b   :  { %1635 = vmatmul.msk.f32.gmra.mxu2 %vm3393_vm12, %v1215_v24  ;;  %vm3401_vm12 = vcmask 31744  }
 0x19c   :  { %734 = vmax.xlane.f32.xlu0 %v733_v49 }
 0x19f   :  { %v288_v1 = vpop.xlane.xlu0 %287 }
 0x1a0   :  { %v863_v35 = vsel %vm3394_vm15, %v288_v1, %v2942_v9  ;;  %vm1209_vm15 = vcmp.eq.s32.totalorder %v1202_v62, 1  ;;  %v1102_v1 = vand.u32 2147483647, %v3023_v33  ;;  %v3093_v62 = vpop.eup %1688 }
 0x1a4   :  { %808 = vmax.xlane.f32.xlu0 %v807_v4 }
 0x1a7   :  { %v399_v17 = vpop.xlane.xlu0 %398 }
 0x1af   :  { %v473_v46 = vpop.xlane.xlu0 %472 }
 0x1b1   :  { %v824_v47 = vpop.xlane.xlu2 %823 }
 0x1b2   :  { %v973_v21 = vsel %vm3395_vm13, %v2979_v41, %v824_v47  ;;  %v608_v41 = vsel %vm2050_vm6, %v2015_v63, -inf  ;;  %vm3402_vm6 = vcmask 39936  }
 0x1b3   :  { %v981_v9 = vsel %vm3396_vm10, %v973_v21, %v2919_v29  ;;  %v607_v29 = vsel %vm2070_vm7, %v2009_v60, -inf  ;;  %vm1068_vm7 = vweird.f32 %v2995_v45  ;;  %vm3403_vm10 = vmmov %vm3398_vm2  ;;  %v1089_v45 = vand.u32 2147483648, %v3006_v12 }
 0x1b4   :  { %v995_v40 = vmax.f32 %v988_v44, %v981_v9  ;;  %v622_v26 = vmax.f32 %v607_v29, %v608_v41  ;;  %vm1070_vm13 = vmor %vm1068_vm7, %vm1069_vm14  ;;  %vm3405_vm7 = vcmask 7168   ;;  %v3406_v44 = vld [vmem:[#allocation15_spill] sm:$0xff]  ;;  %v1341_v29 = vld [vmem:[#allocation9 + $0x18] sm:$0xff] }
 0x1b5   :  { %v1090_v57 = vor.u32 1.1754944e-38, %v1089_v45  ;;  %1660 = vmatpush.msra.mxu3 %v1341_v29  ;;  %1401 = vmatpush.msrb.mxu0 %v1341_v29 }
 0x1b6   :  { %1003 = vst.msk [vmem:[#allocation3 + $0x30] sm:$0xff] %vm3398_vm2, %v995_v40  ;;  %vm1084_vm2 = vweird.f32 %v1685_v59 }
 0x1b7   :  { %v3046_v15 = vpop.xlane.xlu0 %509 }
 0x1b8   :  { %1183 = vperm.xlu0 %1677, %v1175_v48  }
 0x1b9   :  { %v362_v61 = vpop.xlane.xlu2 %361 }
 0x1ba   :  { %v871_v25 = vsel %vm3399_vm5, %v863_v35, %v362_v61  ;;  %vm1083_vm5 = vweird.f32 %v3006_v12  ;;  %v3083_v35 = vpop.permute.xlu1 %1055  ;;  %v1340_v61 = vld [vmem:[#allocation9 + $0x10] sm:$0xff] }
 0x1bb   :  { %v879_v30 = vsel %vm3400_vm11, %v871_v25, %v399_v17  ;;  %vm1085_vm14 = vmor %vm1083_vm5, %vm1084_vm2  ;;  %vm3408_vm5 = vcmask 15360   ;;  %1661 = vmatpush.msra.mxu3 %v1340_v61  ;;  %1402 = vmatpush.msrb.mxu0 %v1340_v61 }
 0x1bc   :  { %v887_v60 = vsel %vm3401_vm12, %v879_v30, %v2981_v37  ;;  %v1071_v37 = vsel %vm1070_vm13, %v1683_v22, %v1067_v43  ;;  %vm3404_vm11 = vmmov %vm3403_vm10  ;;  %v1086_v28 = vsel %vm1085_vm14, %v1685_v59, %v1082_v13  ;;  %vm1088_vm12 = vcmp.eq.f32.partialorder %v1087_v11, 8.507059e+37  ;;  %v1339_v30 = vld [vmem:[#allocation9 + $0x8] sm:$0xff] }
 0x1bd   :  { %v1174_v63 = vld [vmem:[#allocation3 + $0x30] sm:$0xff]  ;;  %v3062_v23 = vsel %vm3402_vm6, %v887_v60, %v473_v46  ;;  %v1076_v2 = vsel %vm1073_vm3, %v1075_v39, %v1071_v37  ;;  %v1091_v24 = vsel %vm1088_vm12, %v1090_v57, %v1086_v28  ;;  %vm1098_vm6 = vweird.f32 %v3023_v33  ;;  %vm3407_vm2 = vmmov %vm3403_vm10  ;;  %1662 = vmatpush.msra.mxu3 %v1339_v30  ;;  %1403 = vmatpush.msrb.mxu0 %v1339_v30 }
 0x1be   :  { %v1216_v38 = vsel %vm1209_vm15, %v1174_v63, 0.0  ;;  %v1077_v53 = vmul.f32 %v1076_v2, %v3397_v34  ;;  %vm1099_vm15 = vweird.f32 %v1687_v55  ;;  %v1092_v12 = vmul.f32 %v1091_v24, %v3392_v16 }
 0x1bf   :  { %v3066_v32 = vpop.xlane.xlu0 %583  ;;  %623 = vmax.xlane.f32.xlu2 %v622_v26  ;;  %1636 = vmatmul.msk.f32.gmra.mxu2 %vm3403_vm10, %v1216_v38  ;;  %vm1100_vm13 = vmor %vm1098_vm6, %vm1099_vm15  ;;  %v1105_v22 = vor.u32 1.1754944e-38, %v1104_v52  ;;  %vm1103_vm3 = vcmp.eq.f32.partialorder %v1102_v1, 8.507059e+37  ;;  %vm3409_vm14 = vcmask 23552   ;;  %vm3411_vm12 = vcmask 39936   ;;  %v1338_v26 = vld [vmem:[#allocation9] sm:$0xff] }
 0x1c0   :  { %v1101_v17 = vsel %vm1100_vm13, %v1687_v55, %v1097_v51  ;;  %v1124_v43 = vmul.f32 %v3093_v62, %v3072_v10  ;;  %vm3414_vm6 = vcmask 56320   ;;  %1663 = vmatpush.msra.mxu3 %v1338_v26  ;;  %1404 = vmatpush.msrb.mxu0 %v1338_v26  ;;  %vm3415_vm13 = vcmask 89088  }
 0x1c1   :  { %v3069_v8 = vpop.xlane.xlu2 %546  ;;  %v1106_v46 = vsel %vm1103_vm3, %v1105_v22, %v1101_v17 }
 0x1c2   :  { %v1107_v47 = vmul.f32 %v1106_v46, %v3406_v44  ;;  %v1125_v60 = vsub.f32 1.0, %v1124_v43 }
 0x1c7   :  { %v328_v27 = vpop.xlane.xlu0 %327  ;;  %1637 = vmatmul.msk.f32.gmra.mxu2 %vm3404_vm11, %v1077_v53  ;;  %vm3410_vm11 = vcmask 31744  }
 0x1c9   :  { %v291_v49 = vpop.xlane.xlu2 %290 }
 0x1ca   :  { %v864_v5 = vsel %vm3405_vm7, %v291_v49, %v328_v27  ;;  %vm3412_vm7 = vcmask 48128  }
 0x1cb   :  { %v365_v21 = vpop.xlane.xlu1 %364  ;;  %vm3413_vm15 = vmmov %vm3412_vm7 }
 0x1cc   :  { %v872_v16 = vsel %vm3408_vm5, %v864_v5, %v365_v21  ;;  %v903_v55 = vsel %vm3413_vm15, %v3062_v23, %v3046_v15  ;;  %v1126_v15 = vmul.f32 %v3093_v62, %v1125_v60  ;;  %vm3417_vm5 = vcmask 121856  }
 0x1cd   :  { %v911_v6 = vsel %vm3414_vm6, %v903_v55, %v3069_v8  ;;  %vm3418_vm15 = vcmask 130048  }
 0x1ce   :  { %v919_v63 = vsel %vm918_vm9, %v911_v6, %v3066_v32  ;;  %v1127_v24 = vadd.f32 %v3093_v62, %v1126_v15 }
 0x1cf   :  { %v658_v4 = vpop.xlane.xlu0 %657  ;;  %1638 = vmatmul.msk.f32.gmra.mxu2 %vm3403_vm10, %v1092_v12 }
 0x1d1   :  { %v621_v18 = vpop.xlane.xlu2 %620 }
 0x1d2   :  { %v927_v0 = vsel %vm926_vm8, %v919_v63, %v621_v18  ;;  %v1132_v18 = vand.u32 2147483647, %v3072_v10 }
 0x1d3   :  { %v935_v23 = vsel %vm934_vm4, %v927_v0, %v658_v4  ;;  %v1134_v4 = vand.u32 2147483648, %v3072_v10  ;;  %v550_v29 = vpop.xlane.xlu1 %549 }
 0x1d5   :  { %v1135_v21 = vor.u32 1.1754944e-38, %v1134_v4 }
 0x1d7   :  { %v695_v20 = vpop.xlane.xlu0 %694  ;;  %1639 = vmatmul.msk.f32.gmra.mxu2 %vm3407_vm2, %v1107_v47  ;;  %vm3416_vm2 = vcmask 113664  }
 0x1d8   :  { %v943_v3 = vsel %vm3415_vm13, %v935_v23, %v695_v20  ;;  %vm3419_vm13 = vmmov %vm3418_vm15 }
 0x1d9   :  { %v402_v33 = vpop.xlane.xlu2 %401 }
 0x1da   :  { %v880_v9 = vsel %vm3409_vm14, %v872_v16, %v402_v33 }
 0x1df   :  { %v732_v59 = vpop.xlane.xlu0 %731 }
 0x1e0   :  { %v951_v13 = vsel %vm950_vm1, %v943_v3, %v732_v59 }
 0x1e1   :  { %v439_v40 = vpop.xlane.xlu2 %438 }
 0x1e2   :  { %v888_v34 = vsel %vm3410_vm11, %v880_v9, %v439_v40  ;;  %vm1129_vm11 = vweird.f32 %v3093_v62  ;;  %v1147_v9 = vand.u32 2147483647, %v3083_v35 }
 0x1e7   :  { %v769_v36 = vpop.xlane.xlu0 %768 }
 0x1e8   :  { %v959_v11 = vsel %vm958_vm0, %v951_v13, %v769_v36 }
 0x1e9   :  { %v476_v19 = vpop.xlane.xlu2 %475 }
 0x1ea   :  { %v896_v48 = vsel %vm3411_vm12, %v888_v34, %v476_v19  ;;  %v3145_v19 = vld [vmem:[%s3254_s3] ss:$0 sm:$0xff] }
 0x1ef   :  { %v513_v41 = vpop.xlane.xlu0 %512 }
 0x1f0   :  { %v3096_v25 = vsel %vm3412_vm7, %v896_v48, %v513_v41  ;;  %vm1128_vm7 = vweird.f32 %v3072_v10 }
 0x1f1   :  { %v1046_v58 = vpop.permute.xlu2 %1045  ;;  %vm1130_vm6 = vmor %vm1128_vm7, %vm1129_vm11  ;;  %vm1148_vm11 = vcmp.eq.f32.partialorder %v1147_v9, 8.507059e+37 }
 0x1f2   :  { %1690 = vrcp.f32 %v1046_v58  ;;  %v1119_v32 = vand.u32 2147483648, %v1046_v58  ;;  %v1117_v53 = vand.u32 2147483647, %v1046_v58  ;;  %vm1113_vm3 = vweird.f32 %v1046_v58 }
 0x1f3   :  { %1692 = vrcp.f32 %v3083_v35  ;;  %v1131_v47 = vsel %vm1130_vm6, %v3093_v62, %v1127_v24 }
 0x1f4   :  { %v1120_v49 = vor.u32 1.1754944e-38, %v1119_v32  ;;  %vm1118_vm12 = vcmp.eq.f32.partialorder %v1117_v53, 8.507059e+37 }
 0x1f7   :  { %v806_v14 = vpop.xlane.xlu0 %805 }
 0x1f8   :  { %v1691_v38 = vpop.eup %1690  ;;  %v967_v27 = vsel %vm3416_vm2, %v959_v11, %v806_v14  ;;  %v587_v14 = vpop.xlane.xlu1 %586 }
 0x1f9   :  { %v3109_v31 = vpop.eup %1692  ;;  %v1109_v37 = vmul.f32 %v1691_v38, %v1046_v58  ;;  %v3111_v39 = vpop.permute.xlu2 %1060  ;;  %vm1114_vm10 = vweird.f32 %v1691_v38 }
 0x1fa   :  { %v1139_v2 = vmul.f32 %v3109_v31, %v3083_v35  ;;  %1694 = vrcp.f32 %v3111_v39  ;;  %vm1115_vm14 = vmor %vm1113_vm3, %vm1114_vm10  ;;  %vm1143_vm10 = vweird.f32 %v3083_v35  ;;  %vm1133_vm3 = vcmp.eq.f32.partialorder %v1132_v18, 8.507059e+37 }
 0x1fb   :  { %v1110_v8 = vsub.f32 1.0, %v1109_v37  ;;  %vm1144_vm2 = vweird.f32 %v3109_v31  ;;  %v1136_v10 = vsel %vm1133_vm3, %v1135_v21, %v1131_v47  ;;  %v1164_v58 = vand.u32 2147483648, %v3111_v39  ;;  %vm3421_vm3 = vmmov %vm3419_vm13 }
 0x1fc   :  { %v1140_v51 = vsub.f32 1.0, %v1139_v2  ;;  %v1137_v59 = vmul.f32 %v1136_v10, %v2740_v56  ;;  %v1162_v26 = vand.u32 2147483647, %v3111_v39 }
 0x1fd   :  { %v1111_v45 = vmul.f32 %v1691_v38, %v1110_v8  ;;  %v1165_v55 = vor.u32 1.1754944e-38, %v1164_v58 }
 0x1fe   :  { %v1141_v46 = vmul.f32 %v3109_v31, %v1140_v51 }
 0x1ff   :  { %v843_v28 = vpop.xlane.xlu0 %842  ;;  %v1112_v57 = vadd.f32 %v1691_v38, %v1111_v45 }
 0x200   :  { %v975_v5 = vsel %vm3417_vm5, %v967_v27, %v843_v28  ;;  %v1695_v1 = vpop.eup %1694  ;;  %v1142_v33 = vadd.f32 %v3109_v31, %v1141_v46  ;;  %vm1145_vm5 = vmor %vm1143_vm10, %vm1144_vm2  ;;  %vm1163_vm10 = vcmp.eq.f32.partialorder %v1162_v26, 8.507059e+37  ;;  %v698_v23 = vpop.xlane.xlu1 %697 }
 0x201   :  { %v989_v52 = vmax.f32 %v982_v54, %v975_v5  ;;  %v1116_v12 = vsel %vm1115_vm14, %v1691_v38, %v1112_v57  ;;  %v1154_v44 = vmul.f32 %v1695_v1, %v3111_v39  ;;  %vm3420_vm14 = vmmov %vm3419_vm13  ;;  %vm1159_vm7 = vweird.f32 %v1695_v1  ;;  %v983_v57 = vld [vmem:[#allocation3 + $0x8] sm:$0xff] }
 0x202   :  { %v1121_v17 = vsel %vm1118_vm12, %v1120_v49, %v1116_v12  ;;  %v1146_v48 = vsel %vm1145_vm5, %v3109_v31, %v1142_v33  ;;  %vm1346_vm12 = vcmask 261120   ;;  %vm3422_vm5 = vmmov %vm3421_vm3 }
 0x203   :  { %997 = vst.msk [vmem:[#allocation3] sm:$0xff] %vm3418_vm15, %v989_v52  ;;  %v1122_v22 = vmul.f32 %v1121_v17, %v3390_v42  ;;  %v1149_v42 = vand.u32 2147483648, %v3083_v35  ;;  %v1155_v16 = vsub.f32 1.0, %v1154_v44  ;;  %vm1158_vm15 = vweird.f32 %v3111_v39 }
 0x204   :  { %vm1160_vm6 = vmor %vm1158_vm15, %vm1159_vm7  ;;  %vm3425_vm7 = vcmask 113664   ;;  %vm3426_vm15 = vcmask 121856  }
 0x205   :  { %1640 = vmatmul.msk.f32.gmra.mxu2 %vm3419_vm13, %v1122_v22  ;;  %v1150_v40 = vor.u32 1.1754944e-38, %v1149_v42  ;;  %v1156_v36 = vmul.f32 %v1695_v1, %v1155_v16 }
 0x206   :  { %v3134_v20 = vpop.f32.mrf.mxu2 }
 0x207   :  { %v661_v34 = vpop.xlane.xlu0 %660  ;;  %v1151_v61 = vsel %vm1148_vm11, %v1150_v40, %v1146_v48  ;;  %v1157_v62 = vadd.f32 %v1695_v1, %v1156_v36  ;;  %vm3424_vm11 = vcmask 89088  }
 0x208   :  { %v1152_v30 = vmul.f32 %v1151_v61, %v2743_v7  ;;  %v772_v3 = vpop.xlane.xlu1 %771 }
 0x209   :  { %v1161_v43 = vsel %vm1160_vm6, %v1695_v1, %v1157_v62  ;;  %vm3427_vm6 = vmmov %vm3421_vm3 }
 0x20a   :  { %v1166_v38 = vsel %vm1163_vm10, %v1165_v55, %v1161_v43  ;;  %v1168_v2 = vld [vmem:[#allocation3] sm:$0xff] }
 0x20b   :  { %v1167_v31 = vmul.f32 %v1166_v38, %v2753_v50 }
 0x20d   :  { %1641 = vmatmul.msk.f32.gmra.mxu2 %vm3420_vm14, %v1137_v59  ;;  %vm3423_vm14 = vcmask 56320  }
 0x20e   :  { %v1291_v41 = vpop.f32.mrf.mxu2  ;;  %v912_v50 = vsel %vm3423_vm14, %v3096_v25, %v550_v29 }
 0x20f   :  { %v1292_v35 = vadd.f32 %v3145_v19, %v1291_v41  ;;  %v735_v60 = vpop.xlane.xlu0 %734  ;;  %v920_v45 = vsel %vm918_vm9, %v912_v50, %v587_v14 }
 0x210   :  { %v846_v27 = vpop.xlane.xlu1 %845 }
 0x211   :  { %v1327_v56 = vmax.f32 %v1292_v35, 0.0 }
 0x213   :  { %1647 = vmatmul.msk.f32.vlgmr.msra.gmra.mxu3 %vm1346_vm12, %v1327_v56 }
 0x215   :  { %1642 = vmatmul.msk.f32.gmra.mxu2 %vm3419_vm13, %v1152_v30 }
 0x216   :  { %v1294_v6 = vpop.f32.mrf.mxu2 }
 0x217   :  { %v1295_v63 = vadd.f32 %v3145_v19, %v1294_v6  ;;  %v809_v39 = vpop.xlane.xlu0 %808  ;;  %v1289_v6 = vadd.f32 %v3145_v19, %v3134_v20 }
 0x218   :  { %v1187_v51 = vpop.permute.xlu1 %1186 }
 0x219   :  { %v1328_v0 = vmax.f32 %v1295_v63, 0.0 }
 0x21b   :  { %1648 = vmatmul.msk.f32.gmra.mxu3 %vm1346_vm12, %v1328_v0 }
 0x21d   :  { %1643 = vmatmul.msk.f32.gmra.mxu2 %vm3421_vm3, %v1167_v31 }
 0x21e   :  { %v1297_v7 = vpop.f32.mrf.mxu2 }
 0x21f   :  { %v1298_v37 = vadd.f32 %v3145_v19, %v1297_v7 }
 0x221   :  { %v1329_v15 = vmax.f32 %v1298_v37, 0.0 }
 0x223   :  { %1649 = vmatmul.msk.f32.gmra.mxu3 %vm1346_vm12, %v1329_v15 }
 0x22a   :  { %v1184_v8 = vpop.permute.xlu0 %1183 }
 0x22b   :  { %vm1203_vm2 = vcmp.eq.s32.totalorder %v1184_v8, 1 }
 0x22c   :  { %v1210_v32 = vsel %vm1203_vm2, %v1168_v2, 0.0 }
 0x22d   :  { %1630 = vmatmul.msk.f32.vlgmr.msrb.gmra.mxu1 %vm3422_vm5, %v1210_v32 }
 0x232   :  { %v624_v13 = vpop.xlane.xlu2 %623 }
 0x233   :  { %v928_v53 = vsel %vm926_vm8, %v920_v45, %v624_v13  ;;  %vm1204_vm8 = vcmp.eq.s32.totalorder %v1187_v51, 1 }
 0x234   :  { %v936_v11 = vsel %vm934_vm4, %v928_v53, %v661_v34  ;;  %vm3428_vm4 = vmmov %vm3421_vm3 }
 0x235   :  { %v944_v54 = vsel %vm3424_vm11, %v936_v11, %v698_v23 }
 0x236   :  { %v952_v28 = vsel %vm950_vm1, %v944_v54, %v735_v60  ;;  %v1326_v60 = vmax.f32 %v1289_v6, 0.0 }
 0x237   :  { %v960_v49 = vsel %vm958_vm0, %v952_v28, %v772_v3 }
 0x238   :  { %v968_v5 = vsel %vm3425_vm7, %v960_v49, %v809_v39  ;;  %v3205_v39 = vld [vmem:[%s3256_s5] ss:$0 sm:$0xff] }
 0x239   :  { %v976_v24 = vsel %vm3426_vm15, %v968_v5, %v846_v27 }
 0x23a   :  { %v990_v25 = vmax.f32 %v983_v57, %v976_v24 }
 0x23c   :  { %998 = vst.msk [vmem:[#allocation3 + $0x8] sm:$0xff] %vm3427_vm6, %v990_v25 }
 0x242   :  { %v1300_v52 = vpop.f32.mrf.mxu2 }
 0x243   :  { %v1301_v12 = vadd.f32 %v3145_v19, %v1300_v52  ;;  %v1169_v1 = vld [vmem:[#allocation3 + $0x8] sm:$0xff] }
 0x244   :  { %v1211_v4 = vsel %vm1204_vm8, %v1169_v1, 0.0 }
 0x245   :  { %v1330_v17 = vmax.f32 %v1301_v12, 0.0  ;;  %1631 = vmatmul.msk.f32.gmra.mxu1 %vm3428_vm4, %v1211_v4 }
 0x247   :  { %1650 = vmatmul.msk.f32.gmra.mxu3 %vm1346_vm12, %v1330_v17 }
 0x24a   :  { %v1303_v22 = vpop.f32.mrf.mxu2 }
 0x24b   :  { %v1304_v18 = vadd.f32 %v3145_v19, %v1303_v22 }
 0x24d   :  { %v1331_v46 = vmax.f32 %v1304_v18, 0.0 }
 0x24f   :  { %1651 = vmatmul.msk.f32.gmra.mxu3 %vm1346_vm12, %v1331_v46 }
 0x252   :  { %v1306_v44 = vpop.f32.mrf.mxu2 }
 0x253   :  { %v1307_v47 = vadd.f32 %v3145_v19, %v1306_v44 }
 0x255   :  { %v1332_v21 = vmax.f32 %v1307_v47, 0.0 }
 0x257   :  { %1652 = vmatmul.msk.f32.gmra.mxu3 %vm1346_vm12, %v1332_v21 }
 0x25a   :  { %v1309_v42 = vpop.f32.mrf.mxu2 }
 0x25b   :  { %v1310_v10 = vadd.f32 %v3145_v19, %v1309_v42 }
 0x25d   :  { %v1333_v16 = vmax.f32 %v1310_v10, 0.0 }
 0x25f   :  { %1653 = vmatmul.msk.f32.gmra.mxu3 %vm1346_vm12, %v1333_v16 }
 0x288   :  { %v1312_v33 = vpop.f32.mrf.mxu2 }
 0x289   :  { %v1313_v9 = vadd.f32 %v3145_v19, %v1312_v33 }
 0x28b   :  { %v1334_v59 = vmax.f32 %v1313_v9, 0.0 }
 0x28d   :  { %1654 = vmatmul.msk.f32.gmra.mxu3 %vm1346_vm12, %v1334_v59 }
 0x290   :  { %v1315_v40 = vpop.f32.mrf.mxu2 }
 0x291   :  { %v1316_v34 = vadd.f32 %v3145_v19, %v1315_v40 }
 0x293   :  { %v1335_v36 = vmax.f32 %v1316_v34, 0.0 }
 0x295   :  { %1655 = vmatmul.msk.f32.gmra.mxu3 %vm1346_vm12, %v1335_v36 }
 0x296   :  { %v1415_v63 = vpop.f32.mrf.mxu3 }
 0x297   :  { %v1416_v20 = vadd.f32 %v3205_v39, %v1415_v63 }
 0x298   :  { %v1318_v48 = vpop.f32.mrf.mxu2 }
 0x299   :  { %v1319_v29 = vadd.f32 %v3145_v19, %v1318_v48 }
 0x29b   :  { %v1336_v41 = vmax.f32 %v1319_v29, 0.0 }
 0x29d   :  { %1656 = vmatmul.msk.f32.gmra.mxu3 %vm1346_vm12, %v1336_v41 }
 0x29e   :  { %v1418_v14 = vpop.f32.mrf.mxu3 }
 0x29f   :  { %v1419_v32 = vadd.f32 %v3205_v39, %v1418_v14 }
 0x2a0   :  { %v1321_v35 = vpop.f32.mrf.mxu2 }
 0x2a1   :  { %v1322_v61 = vadd.f32 %v3145_v19, %v1321_v35 }
 0x2a3   :  { %v1337_v56 = vmax.f32 %v1322_v61, 0.0 }
 0x2a5   :  { %1657 = vmatmul.msk.f32.gmra.mxu3 %vm1346_vm12, %v1337_v56 }
 0x2a6   :  { %v1421_v38 = vpop.f32.mrf.mxu3 }
 0x2a7   :  { %v1422_v28 = vadd.f32 %v3205_v39, %v1421_v38 }
 0x2aa   :  { %v1282_v62 = vpop.f32.mrf.mxu1 }
 0x2ab   :  { %v1283_v58 = vadd.f32 %v3145_v19, %v1282_v62 }
 0x2ad   :  { %v1324_v30 = vmax.f32 %v1283_v58, 0.0 }
 0x2af   :  { %1644 = vmatmul.msk.f32.vlgmr.msrb.gmra.mxu0 %vm1346_vm12, %v1324_v30 }
 0x2c2   :  { %v1285_v26 = vpop.f32.mrf.mxu1 }
 0x2c3   :  { %v1286_v43 = vadd.f32 %v3145_v19, %v1285_v26 }
 0x2c5   :  { %v1325_v55 = vmax.f32 %v1286_v43, 0.0 }
 0x2c7   :  { %1645 = vmatmul.msk.f32.gmra.mxu0 %vm1346_vm12, %v1325_v55 }
 0x2ca   :  { %v1424_v0 = vpop.f32.mrf.mxu3 }
 0x2cb   :  { %v1425_v1 = vadd.f32 %v3205_v39, %v1424_v0 }
 0x2cf   :  { %1646 = vmatmul.msk.f32.gmra.mxu0 %vm1346_vm12, %v1326_v60 }
 0x2d2   :  { %v1427_v31 = vpop.f32.mrf.mxu3 }
 0x2d3   :  { %v1428_v46 = vadd.f32 %v3205_v39, %v1427_v31 }
 0x2da   :  { %v3198_v7 = vpop.f32.mrf.mxu3 }
 0x2e2   :  { %v3200_v37 = vpop.f32.mrf.mxu3 }
 0x310   :  { %v1436_v15 = vpop.f32.mrf.mxu3 }
 0x311   :  { %v1437_v19 = vadd.f32 %v3205_v39, %v1436_v15 }
 0x313   :  { %v1451_v23 = vadd.f32 %v1437_v19, %v1416_v20 }
 0x315   :  { %v1458_v8 = vsub.f32 0.0, %v1451_v23 }
 0x317   :  { %v1468_v2 = vmul.f32 1.442695, %v1458_v8 }
 0x318   :  { %v1439_v3 = vpop.f32.mrf.mxu3 }
 0x319   :  { %1696 = vpow2.f32 %v1468_v2  ;;  %v1440_v50 = vadd.f32 %v3205_v39, %v1439_v3 }
 0x31b   :  { %v1452_v13 = vadd.f32 %v1440_v50, %v1419_v32 }
 0x31d   :  { %v1459_v45 = vsub.f32 0.0, %v1452_v13 }
 0x31f   :  { %v1697_v53 = vpop.eup %1696  ;;  %v1470_v11 = vmul.f32 1.442695, %v1459_v45 }
 0x320   :  { %v1479_v54 = vadd.f32 1.0, %v1697_v53  ;;  %v1442_v27 = vpop.f32.mrf.mxu3 }
 0x321   :  { %1698 = vpow2.f32 %v1470_v11  ;;  %v1443_v57 = vadd.f32 %v3205_v39, %v1442_v27  ;;  %v1431_v11 = vadd.f32 %v3205_v39, %v3198_v7 }
 0x322   :  { %1700 = vrcp.f32 %v1479_v54  ;;  %v1537_v44 = vand.u32 2147483647, %v1479_v54  ;;  %v1539_v47 = vand.u32 2147483648, %v1479_v54  ;;  %vm1533_vm1 = vweird.f32 %v1479_v54 }
 0x323   :  { %v1453_v49 = vadd.f32 %v1443_v57, %v1422_v28 }
 0x324   :  { %v1540_v36 = vor.u32 1.1754944e-38, %v1539_v47  ;;  %vm1538_vm13 = vcmp.eq.f32.partialorder %v1537_v44, 8.507059e+37  ;;  %v1434_v44 = vadd.f32 %v3205_v39, %v3200_v37 }
 0x325   :  { %v1460_v5 = vsub.f32 0.0, %v1453_v49 }
 0x327   :  { %v1699_v24 = vpop.eup %1698  ;;  %v1472_v25 = vmul.f32 1.442695, %v1460_v5 }
 0x328   :  { %v1701_v51 = vpop.eup %1700  ;;  %v1480_v52 = vadd.f32 1.0, %v1699_v24  ;;  %v1445_v12 = vpop.f32.mrf.mxu3 }
 0x329   :  { %v1529_v4 = vmul.f32 %v1701_v51, %v1479_v54  ;;  %1702 = vpow2.f32 %v1472_v25  ;;  %v1446_v17 = vadd.f32 %v3205_v39, %v1445_v12  ;;  %vm1534_vm0 = vweird.f32 %v1701_v51 }
 0x32a   :  { %1704 = vrcp.f32 %v1480_v52  ;;  %vm1535_vm9 = vmor %vm1533_vm1, %vm1534_vm0  ;;  %v1554_v62 = vand.u32 2147483648, %v1480_v52  ;;  %v1552_v30 = vand.u32 2147483647, %v1480_v52  ;;  %vm1548_vm3 = vweird.f32 %v1480_v52 }
 0x32b   :  { %v1530_v22 = vsub.f32 1.0, %v1529_v4  ;;  %v1454_v18 = vadd.f32 %v1446_v17, %v1425_v1 }
 0x32c   :  { %v1406_v21 = vpop.f32.mrf.mxu0  ;;  %v1555_v60 = vor.u32 1.1754944e-38, %v1554_v62  ;;  %vm1553_vm5 = vcmp.eq.f32.partialorder %v1552_v30, 8.507059e+37 }
 0x32d   :  { %v1531_v42 = vmul.f32 %v1701_v51, %v1530_v22  ;;  %v1461_v10 = vsub.f32 0.0, %v1454_v18  ;;  %v1407_v16 = vadd.f32 %v3205_v39, %v1406_v21 }
 0x32f   :  { %v1703_v33 = vpop.eup %1702  ;;  %v1532_v9 = vadd.f32 %v1701_v51, %v1531_v42  ;;  %v1474_v59 = vmul.f32 1.442695, %v1461_v10  ;;  %v1448_v40 = vadd.f32 %v1428_v46, %v1407_v16 }
 0x330   :  { %v1705_v34 = vpop.eup %1704  ;;  %v1481_v48 = vadd.f32 1.0, %v1703_v33 }
 0x331   :  { %v1536_v29 = vsel %vm1535_vm9, %v1701_v51, %v1532_v9  ;;  %v1544_v41 = vmul.f32 %v1705_v34, %v1480_v52  ;;  %1706 = vpow2.f32 %v1474_v59  ;;  %v1455_v56 = vsub.f32 0.0, %v1448_v40 }
 0x332   :  { %v1541_v35 = vsel %vm1538_vm13, %v1540_v36, %v1536_v29  ;;  %1708 = vrcp.f32 %v1481_v48  ;;  %vm1549_vm10 = vweird.f32 %v1705_v34  ;;  %v1569_v15 = vand.u32 2147483648, %v1481_v48 }
 0x333   :  { %1591 = vst.msk [vmem:[%s3257_s6 + $0x18] sm:$0xff] %vm1346_vm12, %v1541_v35  ;;  %v1545_v61 = vsub.f32 1.0, %v1544_v41  ;;  %v1462_v26 = vmul.f32 1.442695, %v1455_v56  ;;  %vm1550_vm2 = vmor %vm1548_vm3, %vm1549_vm10  ;;  %v1567_v23 = vand.u32 2147483647, %v1481_v48  ;;  %vm1563_vm11 = vweird.f32 %v1481_v48 }
 0x334   :  { %v1570_v32 = vor.u32 1.1754944e-38, %v1569_v15 }
 0x335   :  { %v1546_v58 = vmul.f32 %v1705_v34, %v1545_v61  ;;  %1710 = vpow2.f32 %v1462_v26  ;;  %vm1568_vm15 = vcmp.eq.f32.partialorder %v1567_v23, 8.507059e+37 }
 0x337   :  { %v1707_v43 = vpop.eup %1706  ;;  %v1547_v55 = vadd.f32 %v1705_v34, %v1546_v58 }
 0x338   :  { %v1709_v6 = vpop.eup %1708  ;;  %v1482_v63 = vadd.f32 1.0, %v1707_v43 }
 0x339   :  { %v1551_v14 = vsel %vm1550_vm2, %v1705_v34, %v1547_v55  ;;  %v1559_v38 = vmul.f32 %v1709_v6, %v1481_v48  ;;  %vm1564_vm14 = vweird.f32 %v1709_v6 }
 0x33a   :  { %v1556_v0 = vsel %vm1553_vm5, %v1555_v60, %v1551_v14  ;;  %1712 = vrcp.f32 %v1482_v63  ;;  %vm1565_vm7 = vmor %vm1563_vm11, %vm1564_vm14  ;;  %v1584_v54 = vand.u32 2147483648, %v1482_v63  ;;  %v1582_v57 = vand.u32 2147483647, %v1482_v63 }
 0x33b   :  { %1592 = vst.msk [vmem:[%s3257_s6 + $0x20] sm:$0xff] %vm1346_vm12, %v1556_v0  ;;  %v1560_v31 = vsub.f32 1.0, %v1559_v38  ;;  %v1711_v20 = vpop.eup %1710  ;;  %vm1578_vm8 = vweird.f32 %v1482_v63 }
 0x33c   :  { %v1476_v8 = vadd.f32 1.0, %v1711_v20  ;;  %v1585_v52 = vor.u32 1.1754944e-38, %v1584_v54  ;;  %vm1583_vm0 = vcmp.eq.f32.partialorder %v1582_v57, 8.507059e+37 }
 0x33d   :  { %v1561_v19 = vmul.f32 %v1709_v6, %v1560_v31 }
 0x33e   :  { %1714 = vrcp.f32 %v1476_v8  ;;  %v1494_v7 = vand.u32 2147483648, %v1476_v8  ;;  %v1492_v18 = vand.u32 2147483647, %v1476_v8  ;;  %vm1488_vm9 = vweird.f32 %v1476_v8 }
 0x33f   :  { %v1562_v2 = vadd.f32 %v1709_v6, %v1561_v19 }
 0x340   :  { %v1713_v3 = vpop.eup %1712  ;;  %v1495_v10 = vor.u32 1.1754944e-38, %v1494_v7  ;;  %vm1493_vm10 = vcmp.eq.f32.partialorder %v1492_v18, 8.507059e+37 }
 0x341   :  { %v1566_v50 = vsel %vm1565_vm7, %v1709_v6, %v1562_v2  ;;  %v1574_v13 = vmul.f32 %v1713_v3, %v1482_v63  ;;  %vm1579_vm6 = vweird.f32 %v1713_v3 }
 0x342   :  { %v1571_v45 = vsel %vm1568_vm15, %v1570_v32, %v1566_v50  ;;  %vm1580_vm4 = vmor %vm1578_vm8, %vm1579_vm6 }
 0x343   :  { %1593 = vst.msk [vmem:[%s3257_s6 + $0x28] sm:$0xff] %vm1346_vm12, %v1571_v45  ;;  %v1575_v53 = vsub.f32 1.0, %v1574_v13 }
 0x344   :  { %v1409_v27 = vpop.f32.mrf.mxu0  ;;  %v1715_v5 = vpop.eup %1714 }
 0x345   :  { %v1576_v28 = vmul.f32 %v1713_v3, %v1575_v53  ;;  %v1410_v49 = vadd.f32 %v3205_v39, %v1409_v27  ;;  %v1484_v25 = vmul.f32 %v1715_v5, %v1476_v8  ;;  %vm1489_vm1 = vweird.f32 %v1715_v5 }
 0x346   :  { %vm1490_vm13 = vmor %vm1488_vm9, %vm1489_vm1 }
 0x347   :  { %v1577_v24 = vadd.f32 %v1713_v3, %v1576_v28  ;;  %v1449_v51 = vadd.f32 %v1431_v11, %v1410_v49  ;;  %v1485_v1 = vsub.f32 1.0, %v1484_v25 }
 0x349   :  { %v1581_v12 = vsel %vm1580_vm4, %v1713_v3, %v1577_v24  ;;  %v1456_v4 = vsub.f32 0.0, %v1449_v51  ;;  %v1486_v22 = vmul.f32 %v1715_v5, %v1485_v1 }
 0x34a   :  { %v1586_v17 = vsel %vm1583_vm0, %v1585_v52, %v1581_v12 }
 0x34b   :  { %1594 = vst.msk [vmem:[%s3257_s6 + $0x30] sm:$0xff] %vm1346_vm12, %v1586_v17  ;;  %v1464_v46 = vmul.f32 1.442695, %v1456_v4  ;;  %v1487_v21 = vadd.f32 %v1715_v5, %v1486_v22 }
 0x34c   :  { %v1412_v47 = vpop.f32.mrf.mxu0 }
 0x34d   :  { %1716 = vpow2.f32 %v1464_v46  ;;  %v1413_v42 = vadd.f32 %v3205_v39, %v1412_v47  ;;  %v1491_v16 = vsel %vm1490_vm13, %v1715_v5, %v1487_v21 }
 0x34e   :  { %v1496_v9 = vsel %vm1493_vm10, %v1495_v10, %v1491_v16 }
 0x34f   :  { %v1450_v33 = vadd.f32 %v1434_v44, %v1413_v42  ;;  %1588 = vst.msk [vmem:[%s3257_s6] sm:$0xff] %vm1346_vm12, %v1496_v9 }
 0x351   :  { %v1457_v59 = vsub.f32 0.0, %v1450_v33 }
 0x353   :  { %v1717_v40 = vpop.eup %1716  ;;  %v1466_v37 = vmul.f32 1.442695, %v1457_v59 }
 0x354   :  { %v1477_v34 = vadd.f32 1.0, %v1717_v40 }
 0x355   :  { %1718 = vpow2.f32 %v1466_v37 }
 0x356   :  { %1720 = vrcp.f32 %v1477_v34  ;;  %v1509_v35 = vand.u32 2147483648, %v1477_v34  ;;  %v1507_v56 = vand.u32 2147483647, %v1477_v34  ;;  %vm1503_vm2 = vweird.f32 %v1477_v34 }
 0x358   :  { %v1510_v30 = vor.u32 1.1754944e-38, %v1509_v35  ;;  %vm1508_vm14 = vcmp.eq.f32.partialorder %v1507_v56, 8.507059e+37 }
 0x35b   :  { %v1719_v36 = vpop.eup %1718 }
 0x35c   :  { %v1721_v48 = vpop.eup %1720  ;;  %v1478_v39 = vadd.f32 1.0, %v1719_v36 }
 0x35d   :  { %v1499_v29 = vmul.f32 %v1721_v48, %v1477_v34  ;;  %vm1504_vm3 = vweird.f32 %v1721_v48 }
 0x35e   :  { %1722 = vrcp.f32 %v1478_v39  ;;  %vm1505_vm5 = vmor %vm1503_vm2, %vm1504_vm3  ;;  %v1524_v60 = vand.u32 2147483648, %v1478_v39  ;;  %v1522_v14 = vand.u32 2147483647, %v1478_v39  ;;  %vm1518_vm7 = vweird.f32 %v1478_v39 }
 0x35f   :  { %v1500_v41 = vsub.f32 1.0, %v1499_v29 }
 0x360   :  { %v1525_v0 = vor.u32 1.1754944e-38, %v1524_v60  ;;  %vm1523_vm6 = vcmp.eq.f32.partialorder %v1522_v14, 8.507059e+37 }
 0x361   :  { %v1501_v61 = vmul.f32 %v1721_v48, %v1500_v41 }
 0x363   :  { %v1502_v62 = vadd.f32 %v1721_v48, %v1501_v61 }
 0x364   :  { %v1723_v58 = vpop.eup %1722 }
 0x365   :  { %v1506_v26 = vsel %vm1505_vm5, %v1721_v48, %v1502_v62  ;;  %v1514_v43 = vmul.f32 %v1723_v58, %v1478_v39  ;;  %vm1519_vm11 = vweird.f32 %v1723_v58 }
 0x366   :  { %v1511_v55 = vsel %vm1508_vm14, %v1510_v30, %v1506_v26  ;;  %vm1520_vm15 = vmor %vm1518_vm7, %vm1519_vm11 }
 0x367   :  { %1589 = vst.msk [vmem:[%s3257_s6 + $0x8] sm:$0xff] %vm1346_vm12, %v1511_v55  ;;  %v1515_v6 = vsub.f32 1.0, %v1514_v43 }
 0x369   :  { %v1516_v63 = vmul.f32 %v1723_v58, %v1515_v6 }
 0x36b   :  { %v1517_v38 = vadd.f32 %v1723_v58, %v1516_v63 }
 0x36d   :  { %v1521_v31 = vsel %vm1520_vm15, %v1723_v58, %v1517_v38 }
 0x36e   :  { %v1526_v15 = vsel %vm1523_vm6, %v1525_v0, %v1521_v31 }
 0x36f   :  { %1590 = vst.msk [vmem:[%s3257_s6 + $0x10] sm:$0xff] %vm1346_vm12, %v1526_v15 }
 0x370   :  { %1599 = vsyncpa [#allocation5], 1 }
 0x371   :  { %1600 = vsyncpa [#allocation7], 1 }
 0x372   :  { %1601 = vsyncpa [#allocation10], 1 }

</bundles_post_ra>
